<compile_context>
chip_gen: v7x
topology: tpu7x:2x2x1
jax: 0.10.0
libtpu: 0.0.40
codegen_flags: <defaults>
</compile_context>

<pallas_src>
import jax
import jax.numpy as jnp
from jax.experimental import pallas as pl
from jax.experimental.pallas import tpu as pltpu

LANES = 128          # batch rows packed per lane-dense row
ALIGN = 1024         # batch padding granularity -> packed rows always 8-aligned


def lmm_kernel(bias_ref, xf_ref, xr_ref, wf_ref, wr_ref, out_ref):
    # bias_ref : SMEM (1,) f32          — pre-summed b_fixed + b_random
    # xf_ref   : VMEM (TR, 128*F) tile  — 128 batch rows packed per row
    # xr_ref   : VMEM (TR, 128*R) tile
    # wf_ref   : VMEM (128*F, 128)      — block-diag weight, resident (const idx)
    # wr_ref   : VMEM (128*R, 128)      — block-diag weight, resident
    # out_ref  : VMEM (TR, 128) tile    — lane-dense packed output
    acc = jnp.dot(xf_ref[...], wf_ref[...], preferred_element_type=jnp.float32)
    acc = acc + jnp.dot(xr_ref[...], wr_ref[...],
                        preferred_element_type=jnp.float32)
    out_ref[...] = (acc + bias_ref[0]).astype(out_ref.dtype)


def _block_diag_weight(w_row, lanes=LANES):
    """(1, F) nn.Linear weight -> (lanes*F, lanes) block-diagonal matrix.

    Column j holds w in rows j*F:(j+1)*F and zeros elsewhere, so that a
    lane-packed input row [.., lanes*F] @ W_bd gives the per-batch-row dot
    product for 128 consecutive batch rows, already lane-dense.
    """
    f = w_row.shape[-1]
    eye = jnp.eye(lanes, dtype=w_row.dtype)                       # (lanes, lanes)
    return (eye[:, None, :] * w_row.reshape(1, f, 1)).reshape(lanes * f, lanes)


def linear_mixed_model(fixed_inputs, random_inputs,
                       w_fixed, b_fixed, w_random, b_random,
                       *, block_b=16384):
    """fixed_inputs [B,F], random_inputs [B,R], w_* [1,in], b_* [1] -> [B,1]."""
    B, F = fixed_inputs.shape
    _, R = random_inputs.shape
    dt = fixed_inputs.dtype

    # Pad batch to a multiple of 1024 (keeps every sublane dim 8-aligned and
    # makes the lane packing exact).  Only copies when B is not aligned.
    B_pad = ((B + ALIGN - 1) // ALIGN) * ALIGN
    if B_pad != B:
        fixed_inputs = jnp.pad(fixed_inputs, ((0, B_pad - B), (0, 0)))
        random_inputs = jnp.pad(random_inputs, ((0, B_pad - B), (0, 0)))

    # Zero-copy lane packing: 128 consecutive batch rows per packed row.
    rows = B_pad // LANES
    xf = fixed_inputs.reshape(rows, LANES * F)
    xr = random_inputs.reshape(rows, LANES * R)

    # VMEM-resident block-diagonal weights (f32: 2 MiB fixed + 1 MiB random).
    wf = _block_diag_weight(jnp.reshape(w_fixed, (1, F)).astype(dt))
    wr = _block_diag_weight(jnp.reshape(w_random, (1, R)).astype(dt))

    # Fuse the two biases into a single SMEM scalar.
    bias = (jnp.reshape(b_fixed, (-1,))[:1]
            + jnp.reshape(b_random, (-1,))[:1]).astype(jnp.float32)

    # Tile: block_b batch rows per grid step  ->  tr packed rows (>= 3 MiB of
    # useful input per step at the default; tr is 8-aligned or the full dim).
    tr_cap = max(block_b // LANES, 8)
    tr = rows if rows <= tr_cap else tr_cap
    grid = (pl.cdiv(rows, tr),)

    itemsize = jnp.dtype(dt).itemsize
    cost = pl.CostEstimate(
        flops=2 * B_pad * (F + R),
        transcendentals=0,
        bytes_accessed=(B_pad * (F + R) * itemsize          # input stream
                        + B_pad * itemsize                   # output
                        + LANES * (F + R) * LANES * itemsize),  # weights (once)
    )

    out_packed = pl.pallas_call(
        lmm_kernel,
        out_shape=jax.ShapeDtypeStruct((rows, LANES), dt),
        grid=grid,
        in_specs=[
            pl.BlockSpec(memory_space=pltpu.MemorySpace.SMEM),    # fused bias
            pl.BlockSpec((tr, LANES * F), lambda i: (i, 0)),      # packed fixed
            pl.BlockSpec((tr, LANES * R), lambda i: (i, 0)),      # packed random
            pl.BlockSpec((LANES * F, LANES), lambda i: (0, 0)),   # W_f (resident)
            pl.BlockSpec((LANES * R, LANES), lambda i: (0, 0)),   # W_r (resident)
        ],
        out_specs=pl.BlockSpec((tr, LANES), lambda i: (i, 0)),    # lane-dense out
        compiler_params=pltpu.CompilerParams(
            dimension_semantics=("parallel",),        # megacore sharding on v7x
            vmem_limit_bytes=32 * 1024 * 1024),
        cost_estimate=cost,
    )(bias, xf, xr, wf, wr)

    # Free relayout back to nn.Linear's [B, 1] output; drop padded rows.
    return out_packed.reshape(B_pad, 1)[:B]


def init_linear_params(key, fan_in, dtype=jnp.float32):
    """Mimics nn.Linear default init: U(-1/sqrt(fan_in), 1/sqrt(fan_in))."""
    kw, kb = jax.random.split(key)
    bound = 1.0 / jnp.sqrt(jnp.asarray(fan_in, dtype))
    w = jax.random.uniform(kw, (1, fan_in), dtype, minval=-bound, maxval=bound)
    b = jax.random.uniform(kb, (1,), dtype, minval=-bound, maxval=bound)
    return w, b


if __name__ == "__main__":
    key = jax.random.PRNGKey(0)
    k_xf, k_xr, k_wf, k_wr = jax.random.split(key, 4)

    B, F, R = 8, 32, 16  # batch, num_fixed_effects, num_random_effects
    fixed_inputs = jax.random.normal(k_xf, (B, F), jnp.float32)
    random_inputs = jax.random.normal(k_xr, (B, R), jnp.float32)

    w_fixed, b_fixed = init_linear_params(k_wf, F)
    w_random, b_random = init_linear_params(k_wr, R)

    out = linear_mixed_model(fixed_inputs, random_inputs,
                             w_fixed, b_fixed, w_random, b_random)
    out = jax.block_until_ready(out)

    # Pure-JAX reference check (nn.Linear semantics: x @ W^T + b)
    ref = (fixed_inputs @ w_fixed.T + b_fixed) + (random_inputs @ w_random.T + b_random)
    assert out.shape == (B, 1)
    assert jnp.allclose(out, ref, atol=2e-3, rtol=2e-3), \
        float(jnp.max(jnp.abs(out - ref)))

    print("KERNEL_OK")
</pallas_src>

<mosaic_0001>
module attributes {stable_mosaic.version = 11 : i64} {
  func.func @lmm_kernel(%arg0: i32, %arg1: memref<1xf32, #tpu.memory_space<smem>>, %arg2: memref<8x4096xf32, #tpu.memory_space<vmem>>, %arg3: memref<8x2048xf32, #tpu.memory_space<vmem>>, %arg4: memref<4096x128xf32, #tpu.memory_space<vmem>>, %arg5: memref<2048x128xf32, #tpu.memory_space<vmem>>, %arg6: memref<8x128xf32, #tpu.memory_space<vmem>>) attributes {dimension_semantics = [#tpu.dimension_semantics<parallel>], iteration_bounds = array<i64: 1>, scalar_prefetch = 0 : i64, scratch_operands = 0 : i64, tpu.core_type = #tpu.core_type<tc>, window_params = [{transform_indices = @transform_0, window_bounds = array<i64: 1>}, {transform_indices = @transform_1, window_bounds = array<i64: 8, 4096>}, {transform_indices = @transform_2, window_bounds = array<i64: 8, 2048>}, {pipeline_mode = #tpu.pipeline_mode<synchronous>, transform_indices = @transform_3, window_bounds = array<i64: 4096, 128>}, {pipeline_mode = #tpu.pipeline_mode<synchronous>, transform_indices = @transform_4, window_bounds = array<i64: 2048, 128>}, {transform_indices = @transform_5, window_bounds = array<i64: 8, 128>}]} {
    %c0 = arith.constant 0 : index
    %c0_0 = arith.constant 0 : index
    %0 = vector.load %arg2[%c0, %c0_0] : memref<8x4096xf32, #tpu.memory_space<vmem>>, vector<8x4096xf32>
    %c0_1 = arith.constant 0 : index
    %c0_2 = arith.constant 0 : index
    %1 = vector.load %arg4[%c0_1, %c0_2] : memref<4096x128xf32, #tpu.memory_space<vmem>>, vector<4096x128xf32>
    %cst = arith.constant dense<0.000000e+00> : vector<8x128xf32>
    %2 = tpu.matmul %0, %1, %cst {dimension_numbers = #tpu.dot_dimension_numbers<[1], [0], [0], [1], [0, 0, 1, 1], [], []>} : vector<8x4096xf32>, vector<4096x128xf32>, vector<8x128xf32> -> vector<8x128xf32>
    %c0_3 = arith.constant 0 : index
    %c0_4 = arith.constant 0 : index
    %3 = vector.load %arg3[%c0_3, %c0_4] : memref<8x2048xf32, #tpu.memory_space<vmem>>, vector<8x2048xf32>
    %c0_5 = arith.constant 0 : index
    %c0_6 = arith.constant 0 : index
    %4 = vector.load %arg5[%c0_5, %c0_6] : memref<2048x128xf32, #tpu.memory_space<vmem>>, vector<2048x128xf32>
    %cst_7 = arith.constant dense<0.000000e+00> : vector<8x128xf32>
    %5 = tpu.matmul %3, %4, %cst_7 {dimension_numbers = #tpu.dot_dimension_numbers<[1], [0], [0], [1], [0, 0, 1, 1], [], []>} : vector<8x2048xf32>, vector<2048x128xf32>, vector<8x128xf32> -> vector<8x128xf32>
    %6 = arith.addf %2, %5 : vector<8x128xf32>
    %c0_8 = arith.constant 0 : index
    %7 = memref.load %arg1[%c0_8] : memref<1xf32, #tpu.memory_space<smem>>
    %8 = vector.broadcast %7 : f32 to vector<8x128xf32>
    %9 = arith.addf %6, %8 : vector<8x128xf32>
    %c0_9 = arith.constant 0 : index
    %c0_10 = arith.constant 0 : index
    %10 = vector.load %arg6[%c0_9, %c0_10] : memref<8x128xf32, #tpu.memory_space<vmem>>, vector<8x128xf32>
    tpu.vector_store %arg6[%c0_9, %c0_10], %9 {strides = array<i32>} : memref<8x128xf32, #tpu.memory_space<vmem>>, vector<8x128xf32>,
    return
  }
  func.func @transform_0(%arg0: i32) -> i32 {
    %c0_i32 = arith.constant 0 : i32
    %c0_i32_0 = arith.constant 0 : i32
    return %c0_i32 : i32
  }
  func.func @transform_1(%arg0: i32) -> (i32, i32) {
    %c0_i32 = arith.constant 0 : i32
    %c0_i32_0 = arith.constant 0 : i32
    return %arg0, %c0_i32 : i32, i32
  }
  func.func @transform_2(%arg0: i32) -> (i32, i32) {
    %c0_i32 = arith.constant 0 : i32
    %c0_i32_0 = arith.constant 0 : i32
    return %arg0, %c0_i32 : i32, i32
  }
  func.func @transform_3(%arg0: i32) -> (i32, i32) {
    %c0_i32 = arith.constant 0 : i32
    %c0_i32_0 = arith.constant 0 : i32
    %c0_i32_1 = arith.constant 0 : i32
    return %c0_i32, %c0_i32_0 : i32, i32
  }
  func.func @transform_4(%arg0: i32) -> (i32, i32) {
    %c0_i32 = arith.constant 0 : i32
    %c0_i32_0 = arith.constant 0 : i32
    %c0_i32_1 = arith.constant 0 : i32
    return %c0_i32, %c0_i32_0 : i32, i32
  }
  func.func @transform_5(%arg0: i32) -> (i32, i32) {
    %c0_i32 = arith.constant 0 : i32
    %c0_i32_0 = arith.constant 0 : i32
    return %arg0, %c0_i32 : i32, i32
  }
}

</mosaic_0001>

<bundles_post_ra>
// kernel: tpu_custom_call.1
= control target key start
LH: loop header
LB: loop body
LE: loop exit
PB: predicated region body
PF: predicated region fallthrough
CT: control target
= control target key end

     0   :  { %11 = vsyncpa [#allocation4], 0  ;;  %s4435_s0 = inlined_call_operand.<no memory space> [shape: f32[1], index: 0, kind: input, shape index: {}]   ;;  %s4436_s1 = inlined_call_operand.hbm [shape: f32[8,4096], index: 1, kind: input, shape index: {}]   ;;  %s4437_s2 = inlined_call_operand.hbm [shape: f32[8,2048], index: 2, kind: input, shape index: {}]   ;;  %s4438_s3 = inlined_call_operand.hbm [shape: f32[4096,128], index: 3, kind: input, shape index: {}]   ;;  %s4439_s4 = inlined_call_operand.hbm [shape: f32[2048,128], index: 4, kind: input, shape index: {}]   ;;  %s4440_s5 = inlined_call_operand.hbm [shape: f32[8,128], index: 5, kind: output, shape index: {}]  }
   0x1   :  { %12 = vsyncpa [#allocation7], 0 }
   0x2   :  { %13 = vsyncpa [#allocation10], 0 }
   0x3   :  { %14 = vsyncpa [#allocation5], 0  ;;  %s4323_s18 = smov [#allocation6]   ;;  %s4324_s20 = smov [#allocation3]  }
   0x4   :  { %s33_s19 = sshll.u32 %s4323_s18, 4  ;;  %s23_s21 = sshll.u32 %s4324_s20, 4  ;;  %s34_s19 = int_to_ptr.vmem [resolvable:$true] %s33_s19  ;;  %s24_s21 = int_to_ptr.vmem [resolvable:$true] %s23_s21 }
   0x5   :  { %s4205_s24 = scalar_lea.hbm %s4437_s2, 2048 }
   0x6   :  { %p4206_p0 = scmp.ne.s32.totalorder %s4437_s2, %s4205_s24  ;;  %p4209_p1 = scmp.lt.u32.totalorder %s4205_s24, %s4437_s2 }
   0x8   :  { %p4211_p2 = pnand %p4209_p1, %p4206_p0 }
   0xa   :  { %4214 = shalt.err (!%p4211_p2)
}
   0xb   :  { %s4215_s29 = scalar_lea.vmem %s34_s19, 2048  ;;  %p4220_p4 = scmp.lt.s32.totalorder %s34_s19, %s34_s19 }
   0xc   :  { %p4216_p3 = scmp.ne.s32.totalorder %s34_s19, %s4215_s29  ;;  %p4221_p5 = scmp.lt.s32.totalorder %s4215_s29, %s4215_s29 }
   0xe   :  { %p4222_p6 = por %p4221_p5, %p4220_p4 }
  0x10   :  { %p4223_p7 = pnand %p4222_p6, %p4216_p3 }
  0x12   :  { %4226 = shalt.err (!%p4223_p7)
}
  0x13   :  { %36 = dma.hbm_to_vmem [thread:$0]  %s4437_s2, 2048, %s34_s19, [#allocation7]  }
  0x14   :  { %s4227_s9 = scalar_lea.hbm %s4436_s1, 4096 }
  0x15   :  { %p4228_p8 = scmp.ne.s32.totalorder %s4436_s1, %s4227_s9  ;;  %p4231_p9 = scmp.lt.u32.totalorder %s4227_s9, %s4436_s1 }
  0x17   :  { %p4233_p10 = pnand %p4231_p9, %p4228_p8 }
  0x19   :  { %4236 = shalt.err (!%p4233_p10)
}
  0x1a   :  { %s4237_s14 = scalar_lea.vmem %s24_s21, 4096  ;;  %p4242_p12 = scmp.lt.s32.totalorder %s24_s21, %s24_s21 }
  0x1b   :  { %p4238_p11 = scmp.ne.s32.totalorder %s24_s21, %s4237_s14  ;;  %p4243_p13 = scmp.lt.s32.totalorder %s4237_s14, %s4237_s14 }
  0x1d   :  { %p4244_p0 = por %p4243_p13, %p4242_p12 }
  0x1f   :  { %p4245_p1 = pnand %p4244_p0, %p4238_p11 }
  0x21   :  { %4248 = shalt.err (!%p4245_p1)
}
  0x22   :  { %26 = dma.hbm_to_vmem [thread:$0]  %s4436_s1, 4096, %s24_s21, [#allocation4]  }
  0x23   :  { %s4325_s16 = smov [#allocation8]   ;;  %s4249_s20 = scalar_lea.hbm %s4438_s3, 65536 }
  0x24   :  { %s42_s17 = sshll.u32 %s4325_s16, 4  ;;  %p4250_p2 = scmp.ne.s32.totalorder %s4438_s3, %s4249_s20  ;;  %s43_s17 = int_to_ptr.vmem [resolvable:$true] %s42_s17 }
  0x25   :  { %p4253_p3 = scmp.lt.u32.totalorder %s4249_s20, %s4438_s3 }
  0x27   :  { %p4255_p4 = pnand %p4253_p3, %p4250_p2 }
  0x29   :  { %4258 = shalt.err (!%p4255_p4)
}
  0x2a   :  { %s4259_s26 = scalar_lea.vmem %s43_s17, 65536  ;;  %p4264_p6 = scmp.lt.s32.totalorder %s43_s17, %s43_s17 }
  0x2b   :  { %p4260_p5 = scmp.ne.s32.totalorder %s43_s17, %s4259_s26  ;;  %p4265_p7 = scmp.lt.s32.totalorder %s4259_s26, %s4259_s26 }
  0x2d   :  { %p4266_p8 = por %p4265_p7, %p4264_p6 }
  0x2f   :  { %p4267_p9 = pnand %p4266_p8, %p4260_p5 }
  0x31   :  { %4270 = shalt.err (!%p4267_p9)
}
  0x32   :  { %s4326_s1 = smov 128   ;;  %s4327_s21 = smov 8  }
  0x33   :  { %48 = dma.hbm_to_vmem [thread:$0]  %s4438_s3, 65536, %s43_s17, [#allocation7], %s4326_s1, %s4326_s1, %s4327_s21  }
  0x34   :  { %s4328_s29 = smov [#allocation9]   ;;  %s4271_s8 = scalar_lea.hbm %s4439_s4, 32768 }
  0x35   :  { %s54_s30 = sshll.u32 %s4328_s29, 4  ;;  %p4272_p10 = scmp.ne.s32.totalorder %s4439_s4, %s4271_s8  ;;  %s55_s30 = int_to_ptr.vmem [resolvable:$true] %s54_s30 }
  0x36   :  { %p4275_p11 = scmp.lt.u32.totalorder %s4271_s8, %s4439_s4 }
  0x38   :  { %p4277_p12 = pnand %p4275_p11, %p4272_p10 }
  0x3a   :  { %4280 = shalt.err (!%p4277_p12)
}
  0x3b   :  { %s4281_s13 = scalar_lea.vmem %s55_s30, 32768  ;;  %p4286_p0 = scmp.lt.s32.totalorder %s55_s30, %s55_s30 }
  0x3c   :  { %p4282_p13 = scmp.ne.s32.totalorder %s55_s30, %s4281_s13  ;;  %p4287_p1 = scmp.lt.s32.totalorder %s4281_s13, %s4281_s13 }
  0x3e   :  { %p4288_p2 = por %p4287_p1, %p4286_p0 }
  0x40   :  { %p4289_p3 = pnand %p4288_p2, %p4282_p13 }
  0x42   :  { %4292 = shalt.err (!%p4289_p3)
}
  0x43   :  { %60 = dma.hbm_to_vmem [thread:$0]  %s4439_s4, 32768, %s55_s30, [#allocation10], %s4326_s1, %s4326_s1, %s4327_s21  }
  0x44   :  { %4315 = dma.done.wait [#allocation4], 4096  }
  0x45   :  { %4316 = vsyncadd [#allocation4], 4294963200 }
  0x46   :  { %4317 = dma.done.wait [#allocation7], 67584  }
  0x47   :  { %4318 = vsyncadd [#allocation7], 4294899712 }
  0x48   :  { %4319 = dma.done.wait [#allocation10], 32768  }
  0x49   :  { %4320 = vsyncadd [#allocation10], 4294934528  ;;  %v649_v0 = vld [vmem:[#allocation9 + $0x80] sm:$0xff]  ;;  %v650_v1 = vld [vmem:[#allocation9 + $0x88] sm:$0xff]  ;;  %s4329_s15 = smov [#allocation11]  }
  0x4a   :  { %v681_v2 = vld [vmem:[#allocation9 + $0x180] sm:$0xff]  ;;  %v3430_v3 = vpack.c.bf16 %v650_v1, %v649_v0  ;;  %v682_v4 = vld [vmem:[#allocation9 + $0x188] sm:$0xff]  ;;  %v651_v11 = vld [vmem:[#allocation9 + $0x90] sm:$0xff]  ;;  %s2579_s16 = sshll.u32 %s4329_s15, 4  ;;  %s2580_s16 = int_to_ptr.vmem [resolvable:$true] %s2579_s16 }
  0x4b   :  { %v633_v5 = vld [vmem:[#allocation9] sm:$0xff]  ;;  %v634_v6 = vld [vmem:[#allocation9 + $0x8] sm:$0xff]  ;;  %v3462_v7 = vpack.c.bf16 %v682_v4, %v681_v2  ;;  %v652_v13 = vld [vmem:[#allocation9 + $0x98] sm:$0xff]  ;;  %s4293_s17 = scalar_lea.vmem %s2580_s16, 128  ;;  %p4298_p5 = scmp.lt.s32.totalorder %s2580_s16, %s2580_s16 }
  0x4c   :  { %v3432_v8 = vpack.c.bf16 %v634_v6, %v633_v5  ;;  %v665_v9 = vld [vmem:[#allocation9 + $0x100] sm:$0xff]  ;;  %v666_v10 = vld [vmem:[#allocation9 + $0x108] sm:$0xff]  ;;  %3431 = vmatprep.subr.bf16.mxu0 %v3430_v3  ;;  %v683_v14 = vld [vmem:[#allocation9 + $0x190] sm:$0xff]  ;;  %v3434_v16 = vpack.c.bf16 %v652_v13, %v651_v11  ;;  %p4294_p4 = scmp.ne.s32.totalorder %s2580_s16, %s4293_s17  ;;  %p4299_p6 = scmp.lt.s32.totalorder %s4293_s17, %s4293_s17 }
  0x4d   :  { %v3464_v12 = vpack.c.bf16 %v666_v10, %v665_v9  ;;  %v684_v15 = vld [vmem:[#allocation9 + $0x198] sm:$0xff]  ;;  %3463 = vmatprep.subr.bf16.mxu1 %v3462_v7  ;;  %v635_v18 = vld [vmem:[#allocation9 + $0x10] sm:$0xff]  ;;  %v653_v23 = vld [vmem:[#allocation9 + $0xa0] sm:$0xff] }
  0x4e   :  { %3433 = vmatpush3.bf16.msra.mxu0 %v3432_v8  ;;  %v3466_v17 = vpack.c.bf16 %v684_v15, %v683_v14  ;;  %v636_v19 = vld [vmem:[#allocation9 + $0x18] sm:$0xff]  ;;  %v667_v20 = vld [vmem:[#allocation9 + $0x110] sm:$0xff]  ;;  %v654_v24 = vld [vmem:[#allocation9 + $0xa8] sm:$0xff]  ;;  %p4300_p7 = por %p4299_p6, %p4298_p5 }
  0x4f   :  { %3465 = vmatpush3.bf16.msra.mxu1 %v3464_v12  ;;  %v3436_v21 = vpack.c.bf16 %v636_v19, %v635_v18  ;;  %v668_v22 = vld [vmem:[#allocation9 + $0x118] sm:$0xff]  ;;  %3435 = vmatprep.subr.bf16.mxu0 %v3434_v16  ;;  %v3438_v26 = vpack.c.bf16 %v654_v24, %v653_v23  ;;  %v685_v27 = vld [vmem:[#allocation9 + $0x1a0] sm:$0xff]  ;;  %v686_v28 = vld [vmem:[#allocation9 + $0x1a8] sm:$0xff] }
  0x50   :  { %3467 = vmatprep.subr.bf16.mxu1 %v3466_v17  ;;  %v3468_v25 = vpack.c.bf16 %v668_v22, %v667_v20  ;;  %v637_v29 = vld [vmem:[#allocation9 + $0x20] sm:$0xff]  ;;  %v3470_v30 = vpack.c.bf16 %v686_v28, %v685_v27  ;;  %v638_v31 = vld [vmem:[#allocation9 + $0x28] sm:$0xff]  ;;  %v655_v35 = vld [vmem:[#allocation9 + $0xb0] sm:$0xff]  ;;  %p4301_p8 = pnand %p4300_p7, %p4294_p4 }
  0x51   :  { %v669_v32 = vld [vmem:[#allocation9 + $0x120] sm:$0xff]  ;;  %v670_v33 = vld [vmem:[#allocation9 + $0x128] sm:$0xff]  ;;  %v3440_v34 = vpack.c.bf16 %v638_v31, %v637_v29  ;;  %v656_v36 = vld [vmem:[#allocation9 + $0xb8] sm:$0xff] }
  0x52   :  { %3437 = vmatpush3.bf16.msra.mxu0 %v3436_v21  ;;  %v687_v37 = vld [vmem:[#allocation9 + $0x1b0] sm:$0xff]  ;;  %v3472_v38 = vpack.c.bf16 %v670_v33, %v669_v32  ;;  %v3442_v39 = vpack.c.bf16 %v656_v36, %v655_v35  ;;  %v688_v40 = vld [vmem:[#allocation9 + $0x1b8] sm:$0xff]  ;;  %v657_v46 = vld [vmem:[#allocation9 + $0xc0] sm:$0xff] }
  0x53   :  { %3469 = vmatpush3.bf16.msra.mxu1 %v3468_v25  ;;  %3439 = vmatprep.subr.bf16.mxu0 %v3438_v26  ;;  %v639_v41 = vld [vmem:[#allocation9 + $0x30] sm:$0xff]  ;;  %v640_v42 = vld [vmem:[#allocation9 + $0x38] sm:$0xff]  ;;  %v3474_v43 = vpack.c.bf16 %v688_v40, %v687_v37  ;;  %v658_v47 = vld [vmem:[#allocation9 + $0xc8] sm:$0xff] }
  0x54   :  { %3471 = vmatprep.subr.bf16.mxu1 %v3470_v30  ;;  %v671_v44 = vld [vmem:[#allocation9 + $0x130] sm:$0xff]  ;;  %v672_v45 = vld [vmem:[#allocation9 + $0x138] sm:$0xff]  ;;  %v689_v48 = vld [vmem:[#allocation9 + $0x1c0] sm:$0xff]  ;;  %v3444_v50 = vpack.c.bf16 %v640_v42, %v639_v41  ;;  %v3446_v52 = vpack.c.bf16 %v658_v47, %v657_v46 }
  0x55   :  { %v690_v49 = vld [vmem:[#allocation9 + $0x1c8] sm:$0xff]  ;;  %v3476_v51 = vpack.c.bf16 %v672_v45, %v671_v44  ;;  %v641_v53 = vld [vmem:[#allocation9 + $0x40] sm:$0xff]  ;;  %v659_v58 = vld [vmem:[#allocation9 + $0xd0] sm:$0xff] }
  0x56   :  { %3441 = vmatpush3.bf16.msra.mxu0 %v3440_v34  ;;  %v642_v54 = vld [vmem:[#allocation9 + $0x48] sm:$0xff]  ;;  %v673_v55 = vld [vmem:[#allocation9 + $0x140] sm:$0xff]  ;;  %v3478_v56 = vpack.c.bf16 %v690_v49, %v689_v48  ;;  %v660_v59 = vld [vmem:[#allocation9 + $0xd8] sm:$0xff] }
  0x57   :  { %3473 = vmatpush3.bf16.msra.mxu1 %v3472_v38  ;;  %3443 = vmatprep.subr.bf16.mxu0 %v3442_v39  ;;  %v674_v57 = vld [vmem:[#allocation9 + $0x148] sm:$0xff]  ;;  %v691_v60 = vld [vmem:[#allocation9 + $0x1d0] sm:$0xff]  ;;  %v692_v61 = vld [vmem:[#allocation9 + $0x1d8] sm:$0xff]  ;;  %v3448_v62 = vpack.c.bf16 %v642_v54, %v641_v53  ;;  %v3450_v0 = vpack.c.bf16 %v660_v59, %v659_v58 }
  0x58   :  { %3475 = vmatprep.subr.bf16.mxu1 %v3474_v43  ;;  %v3480_v63 = vpack.c.bf16 %v674_v57, %v673_v55  ;;  %v643_v1 = vld [vmem:[#allocation9 + $0x50] sm:$0xff]  ;;  %v644_v2 = vld [vmem:[#allocation9 + $0x58] sm:$0xff]  ;;  %v3482_v4 = vpack.c.bf16 %v692_v61, %v691_v60  ;;  %v661_v6 = vld [vmem:[#allocation9 + $0xe0] sm:$0xff] }
  0x59   :  { %v675_v3 = vld [vmem:[#allocation9 + $0x150] sm:$0xff]  ;;  %v676_v5 = vld [vmem:[#allocation9 + $0x158] sm:$0xff]  ;;  %v662_v7 = vld [vmem:[#allocation9 + $0xe8] sm:$0xff]  ;;  %v3452_v10 = vpack.c.bf16 %v644_v2, %v643_v1 }
  0x5a   :  { %3445 = vmatpush3.bf16.msra.mxu0 %v3444_v50  ;;  %v693_v8 = vld [vmem:[#allocation9 + $0x1e0] sm:$0xff]  ;;  %v694_v9 = vld [vmem:[#allocation9 + $0x1e8] sm:$0xff]  ;;  %v3484_v13 = vpack.c.bf16 %v676_v5, %v675_v3  ;;  %v3454_v14 = vpack.c.bf16 %v662_v7, %v661_v6  ;;  %v620_v17 = vld [vmem:[#allocation6 + $0x18] sm:$0xff] }
  0x5b   :  { %3477 = vmatpush3.bf16.msra.mxu1 %v3476_v51  ;;  %3447 = vmatprep.subr.bf16.mxu0 %v3446_v52  ;;  %v645_v11 = vld [vmem:[#allocation9 + $0x60] sm:$0xff]  ;;  %v646_v12 = vld [vmem:[#allocation9 + $0x68] sm:$0xff]  ;;  %v3486_v18 = vpack.c.bf16 %v694_v9, %v693_v8  ;;  %v663_v20 = vld [vmem:[#allocation9 + $0xf0] sm:$0xff] }
  0x5c   :  { %3479 = vmatprep.subr.bf16.mxu1 %v3478_v56  ;;  %v677_v15 = vld [vmem:[#allocation9 + $0x160] sm:$0xff]  ;;  %v618_v16 = vld [vmem:[#allocation6 + $0x8] sm:$0xff]  ;;  %v664_v21 = vld [vmem:[#allocation9 + $0xf8] sm:$0xff]  ;;  %1023 = vmatprep.mubr.f32.mxu1 %v620_v17  ;;  %v3456_v24 = vpack.c.bf16 %v646_v12, %v645_v11 }
  0x5d   :  { %v678_v19 = vld [vmem:[#allocation9 + $0x168] sm:$0xff]  ;;  %953 = vmatprep.mubr.f32.mxu0 %v618_v16  ;;  %v695_v22 = vld [vmem:[#allocation9 + $0x1f0] sm:$0xff]  ;;  %v696_v23 = vld [vmem:[#allocation9 + $0x1f8] sm:$0xff]  ;;  %v3458_v26 = vpack.c.bf16 %v664_v21, %v663_v20 }
  0x5e   :  { %3449 = vmatpush3.bf16.msra.mxu0 %v3448_v62  ;;  %v3488_v25 = vpack.c.bf16 %v678_v19, %v677_v15  ;;  %v647_v27 = vld [vmem:[#allocation9 + $0x70] sm:$0xff]  ;;  %v648_v28 = vld [vmem:[#allocation9 + $0x78] sm:$0xff]  ;;  %v3490_v30 = vpack.c.bf16 %v696_v23, %v695_v22  ;;  %v713_v32 = vld [vmem:[#allocation9 + $0x280] sm:$0xff] }
  0x5f   :  { %3481 = vmatpush3.bf16.msra.mxu1 %v3480_v63  ;;  %3451 = vmatprep.subr.bf16.mxu0 %v3450_v0  ;;  %v679_v29 = vld [vmem:[#allocation9 + $0x170] sm:$0xff]  ;;  %v680_v31 = vld [vmem:[#allocation9 + $0x178] sm:$0xff]  ;;  %v714_v33 = vld [vmem:[#allocation9 + $0x288] sm:$0xff]  ;;  %v3460_v36 = vpack.c.bf16 %v648_v28, %v647_v27 }
  0x60   :  { %3483 = vmatprep.subr.bf16.mxu1 %v3482_v4  ;;  %v745_v34 = vld [vmem:[#allocation9 + $0x380] sm:$0xff]  ;;  %v746_v35 = vld [vmem:[#allocation9 + $0x388] sm:$0xff]  ;;  %v3492_v37 = vpack.c.bf16 %v680_v31, %v679_v29  ;;  %v3494_v38 = vpack.c.bf16 %v714_v33, %v713_v32  ;;  %v715_v44 = vld [vmem:[#allocation9 + $0x290] sm:$0xff] }
  0x61   :  { %v697_v39 = vld [vmem:[#allocation9 + $0x200] sm:$0xff]  ;;  %v698_v40 = vld [vmem:[#allocation9 + $0x208] sm:$0xff]  ;;  %v3526_v42 = vpack.c.bf16 %v746_v35, %v745_v34  ;;  %v716_v45 = vld [vmem:[#allocation9 + $0x298] sm:$0xff] }
  0x62   :  { %3453 = vmatpush3.bf16.msra.mxu0 %v3452_v10  ;;  %v729_v41 = vld [vmem:[#allocation9 + $0x300] sm:$0xff]  ;;  %v730_v43 = vld [vmem:[#allocation9 + $0x308] sm:$0xff]  ;;  %v747_v46 = vld [vmem:[#allocation9 + $0x390] sm:$0xff]  ;;  %v3496_v50 = vpack.c.bf16 %v698_v40, %v697_v39  ;;  %v3498_v52 = vpack.c.bf16 %v716_v45, %v715_v44 }
  0x63   :  { %3485 = vmatpush3.bf16.msra.mxu1 %v3484_v13  ;;  %3455 = vmatprep.subr.bf16.mxu0 %v3454_v14  ;;  %v748_v47 = vld [vmem:[#allocation9 + $0x398] sm:$0xff]  ;;  %v617_v48 = vld [vmem:[#allocation6] sm:$0xff]  ;;  %v619_v49 = vld [vmem:[#allocation6 + $0x10] sm:$0xff]  ;;  %v3528_v51 = vpack.c.bf16 %v730_v43, %v729_v41 }
  0x64   :  { %3487 = vmatprep.subr.bf16.mxu1 %v3486_v18  ;;  %v699_v53 = vld [vmem:[#allocation9 + $0x210] sm:$0xff]  ;;  %v700_v54 = vld [vmem:[#allocation9 + $0x218] sm:$0xff]  ;;  %v3530_v56 = vpack.c.bf16 %v748_v47, %v747_v46  ;;  %v717_v58 = vld [vmem:[#allocation9 + $0x2a0] sm:$0xff] }
  0x65   :  { %v731_v55 = vld [vmem:[#allocation9 + $0x310] sm:$0xff]  ;;  %v732_v57 = vld [vmem:[#allocation9 + $0x318] sm:$0xff]  ;;  %v718_v59 = vld [vmem:[#allocation9 + $0x2a8] sm:$0xff]  ;;  %v3500_v62 = vpack.c.bf16 %v700_v54, %v699_v53 }
  0x66   :  { %3457 = vmatpush3.bf16.msra.mxu0 %v3456_v24  ;;  %v749_v60 = vld [vmem:[#allocation9 + $0x3a0] sm:$0xff]  ;;  %v750_v61 = vld [vmem:[#allocation9 + $0x3a8] sm:$0xff]  ;;  %v3532_v63 = vpack.c.bf16 %v732_v57, %v731_v55  ;;  %v3502_v0 = vpack.c.bf16 %v718_v59, %v717_v58  ;;  %v719_v6 = vld [vmem:[#allocation9 + $0x2b0] sm:$0xff] }
  0x67   :  { %3489 = vmatpush3.bf16.msra.mxu1 %v3488_v25  ;;  %3459 = vmatprep.subr.bf16.mxu0 %v3458_v26  ;;  %v701_v1 = vld [vmem:[#allocation9 + $0x220] sm:$0xff]  ;;  %v702_v2 = vld [vmem:[#allocation9 + $0x228] sm:$0xff]  ;;  %v3534_v4 = vpack.c.bf16 %v750_v61, %v749_v60  ;;  %v720_v7 = vld [vmem:[#allocation9 + $0x2b8] sm:$0xff] }
  0x68   :  { %3491 = vmatprep.subr.bf16.mxu1 %v3490_v30  ;;  %v733_v3 = vld [vmem:[#allocation9 + $0x320] sm:$0xff]  ;;  %v734_v5 = vld [vmem:[#allocation9 + $0x328] sm:$0xff]  ;;  %v751_v8 = vld [vmem:[#allocation9 + $0x3b0] sm:$0xff]  ;;  %v3504_v10 = vpack.c.bf16 %v702_v2, %v701_v1  ;;  %v3506_v12 = vpack.c.bf16 %v720_v7, %v719_v6 }
  0x69   :  { %v752_v9 = vld [vmem:[#allocation9 + $0x3b8] sm:$0xff]  ;;  %v3536_v11 = vpack.c.bf16 %v734_v5, %v733_v3  ;;  %v703_v13 = vld [vmem:[#allocation9 + $0x230] sm:$0xff]  ;;  %v721_v18 = vld [vmem:[#allocation9 + $0x2c0] sm:$0xff] }
  0x6a   :  { %3461 = vmatpush3.bf16.msra.mxu0 %v3460_v36  ;;  %v704_v14 = vld [vmem:[#allocation9 + $0x238] sm:$0xff]  ;;  %v735_v15 = vld [vmem:[#allocation9 + $0x330] sm:$0xff]  ;;  %v3538_v16 = vpack.c.bf16 %v752_v9, %v751_v8  ;;  %v722_v19 = vld [vmem:[#allocation9 + $0x2c8] sm:$0xff] }
  0x6b   :  { %3493 = vmatpush3.bf16.msra.mxu1 %v3492_v37  ;;  %3495 = vmatprep.subr.bf16.mxu0 %v3494_v38  ;;  %v736_v17 = vld [vmem:[#allocation9 + $0x338] sm:$0xff]  ;;  %v753_v20 = vld [vmem:[#allocation9 + $0x3c0] sm:$0xff]  ;;  %v754_v21 = vld [vmem:[#allocation9 + $0x3c8] sm:$0xff]  ;;  %v3508_v22 = vpack.c.bf16 %v704_v14, %v703_v13  ;;  %v3510_v26 = vpack.c.bf16 %v722_v19, %v721_v18 }
  0x6c   :  { %3527 = vmatprep.subr.bf16.mxu1 %v3526_v42  ;;  %v705_v23 = vld [vmem:[#allocation9 + $0x240] sm:$0xff]  ;;  %v622_v24 = vld [vmem:[#allocation6 + $0x28] sm:$0xff]  ;;  %v3540_v25 = vpack.c.bf16 %v736_v17, %v735_v15  ;;  %v624_v29 = vld [vmem:[#allocation6 + $0x38] sm:$0xff]  ;;  %v3542_v30 = vpack.c.bf16 %v754_v21, %v753_v20 }
  0x6d   :  { %954 = vmatmul.mubr.f32.vlgmr.msra.gmra.mrb[0].mxu0 %v617_v48  ;;  %v706_v27 = vld [vmem:[#allocation9 + $0x248] sm:$0xff]  ;;  %v737_v28 = vld [vmem:[#allocation9 + $0x340] sm:$0xff]  ;;  %v723_v32 = vld [vmem:[#allocation9 + $0x2d0] sm:$0xff] }
  0x6e   :  { %1024 = vmatmul.mubr.f32.vlgmr.msra.gmra.mrb[0].mxu1 %v619_v49  ;;  %3497 = vmatpush3.bf16.msra.mxu0 %v3496_v50  ;;  %v738_v31 = vld [vmem:[#allocation9 + $0x348] sm:$0xff]  ;;  %v724_v33 = vld [vmem:[#allocation9 + $0x2d8] sm:$0xff]  ;;  %v755_v34 = vld [vmem:[#allocation9 + $0x3d0] sm:$0xff]  ;;  %v3512_v36 = vpack.c.bf16 %v706_v27, %v705_v23 }
  0x6f   :  { %3529 = vmatpush3.bf16.msra.mxu1 %v3528_v51  ;;  %3499 = vmatprep.subr.bf16.mxu0 %v3498_v52  ;;  %v756_v35 = vld [vmem:[#allocation9 + $0x3d8] sm:$0xff]  ;;  %v3544_v37 = vpack.c.bf16 %v738_v31, %v737_v28  ;;  %v3514_v38 = vpack.c.bf16 %v724_v33, %v723_v32  ;;  %v707_v39 = vld [vmem:[#allocation9 + $0x250] sm:$0xff]  ;;  %v725_v44 = vld [vmem:[#allocation9 + $0x2e0] sm:$0xff] }
  0x70   :  { %3531 = vmatprep.subr.bf16.mxu1 %v3530_v56  ;;  %1093 = vmatprep.mubr.f32.mxu0 %v622_v24  ;;  %v708_v40 = vld [vmem:[#allocation9 + $0x258] sm:$0xff]  ;;  %v739_v41 = vld [vmem:[#allocation9 + $0x350] sm:$0xff]  ;;  %v3546_v42 = vpack.c.bf16 %v756_v35, %v755_v34  ;;  %v726_v45 = vld [vmem:[#allocation9 + $0x2e8] sm:$0xff] }
  0x71   :  { %1163 = vmatprep.mubr.f32.mxu1 %v624_v29  ;;  %v740_v43 = vld [vmem:[#allocation9 + $0x358] sm:$0xff]  ;;  %v757_v46 = vld [vmem:[#allocation9 + $0x3e0] sm:$0xff]  ;;  %v758_v47 = vld [vmem:[#allocation9 + $0x3e8] sm:$0xff]  ;;  %v3516_v48 = vpack.c.bf16 %v708_v40, %v707_v39  ;;  %v3518_v50 = vpack.c.bf16 %v726_v45, %v725_v44 }
  0x72   :  { %3501 = vmatpush3.bf16.msra.mxu0 %v3500_v62  ;;  %v3548_v49 = vpack.c.bf16 %v740_v43, %v739_v41  ;;  %v709_v51 = vld [vmem:[#allocation9 + $0x260] sm:$0xff]  ;;  %v710_v52 = vld [vmem:[#allocation9 + $0x268] sm:$0xff]  ;;  %v3550_v54 = vpack.c.bf16 %v758_v47, %v757_v46  ;;  %v727_v56 = vld [vmem:[#allocation9 + $0x2f0] sm:$0xff] }
  0x73   :  { %3533 = vmatpush3.bf16.msra.mxu1 %v3532_v63  ;;  %3503 = vmatprep.subr.bf16.mxu0 %v3502_v0  ;;  %v741_v53 = vld [vmem:[#allocation9 + $0x360] sm:$0xff]  ;;  %v742_v55 = vld [vmem:[#allocation9 + $0x368] sm:$0xff]  ;;  %v728_v57 = vld [vmem:[#allocation9 + $0x2f8] sm:$0xff]  ;;  %v3520_v60 = vpack.c.bf16 %v710_v52, %v709_v51 }
  0x74   :  { %3535 = vmatprep.subr.bf16.mxu1 %v3534_v4  ;;  %v759_v58 = vld [vmem:[#allocation9 + $0x3f0] sm:$0xff]  ;;  %v760_v59 = vld [vmem:[#allocation9 + $0x3f8] sm:$0xff]  ;;  %v3552_v61 = vpack.c.bf16 %v742_v55, %v741_v53  ;;  %v3522_v62 = vpack.c.bf16 %v728_v57, %v727_v56  ;;  %v777_v4 = vld [vmem:[#allocation9 + $0x480] sm:$0xff] }
  0x75   :  { %v711_v63 = vld [vmem:[#allocation9 + $0x270] sm:$0xff]  ;;  %v712_v0 = vld [vmem:[#allocation9 + $0x278] sm:$0xff]  ;;  %v3554_v2 = vpack.c.bf16 %v760_v59, %v759_v58  ;;  %v778_v5 = vld [vmem:[#allocation9 + $0x488] sm:$0xff] }
  0x76   :  { %3505 = vmatpush3.bf16.msra.mxu0 %v3504_v10  ;;  %v743_v1 = vld [vmem:[#allocation9 + $0x370] sm:$0xff]  ;;  %v744_v3 = vld [vmem:[#allocation9 + $0x378] sm:$0xff]  ;;  %v809_v6 = vld [vmem:[#allocation9 + $0x580] sm:$0xff]  ;;  %v3524_v8 = vpack.c.bf16 %v712_v0, %v711_v63  ;;  %v3558_v10 = vpack.c.bf16 %v778_v5, %v777_v4 }
  0x77   :  { %3537 = vmatpush3.bf16.msra.mxu1 %v3536_v11  ;;  %3507 = vmatprep.subr.bf16.mxu0 %v3506_v12  ;;  %v810_v7 = vld [vmem:[#allocation9 + $0x588] sm:$0xff]  ;;  %v3556_v9 = vpack.c.bf16 %v744_v3, %v743_v1  ;;  %v761_v11 = vld [vmem:[#allocation9 + $0x400] sm:$0xff]  ;;  %v780_v17 = vld [vmem:[#allocation9 + $0x498] sm:$0xff] }
  0x78   :  { %3539 = vmatprep.subr.bf16.mxu1 %v3538_v16  ;;  %v762_v12 = vld [vmem:[#allocation9 + $0x408] sm:$0xff]  ;;  %v793_v13 = vld [vmem:[#allocation9 + $0x500] sm:$0xff]  ;;  %v3590_v14 = vpack.c.bf16 %v810_v7, %v809_v6  ;;  %v779_v16 = vld [vmem:[#allocation9 + $0x490] sm:$0xff] }
  0x79   :  { %v794_v15 = vld [vmem:[#allocation9 + $0x508] sm:$0xff]  ;;  %v811_v18 = vld [vmem:[#allocation9 + $0x590] sm:$0xff]  ;;  %v812_v19 = vld [vmem:[#allocation9 + $0x598] sm:$0xff]  ;;  %v3560_v21 = vpack.c.bf16 %v762_v12, %v761_v11  ;;  %v3562_v24 = vpack.c.bf16 %v780_v17, %v779_v16 }
  0x7a   :  { %3509 = vmatpush3.bf16.msra.mxu0 %v3508_v22  ;;  %v621_v20 = vld [vmem:[#allocation6 + $0x20] sm:$0xff]  ;;  %v623_v22 = vld [vmem:[#allocation6 + $0x30] sm:$0xff]  ;;  %v3592_v23 = vpack.c.bf16 %v794_v15, %v793_v13  ;;  %v3594_v28 = vpack.c.bf16 %v812_v19, %v811_v18  ;;  %v796_v29 = vld [vmem:[#allocation9 + $0x518] sm:$0xff] }
  0x7b   :  { %3541 = vmatpush3.bf16.msra.mxu1 %v3540_v25  ;;  %3511 = vmatprep.subr.bf16.mxu0 %v3510_v26  ;;  %v763_v25 = vld [vmem:[#allocation9 + $0x410] sm:$0xff]  ;;  %v764_v26 = vld [vmem:[#allocation9 + $0x418] sm:$0xff]  ;;  %v782_v31 = vld [vmem:[#allocation9 + $0x4a8] sm:$0xff] }
  0x7c   :  { %3543 = vmatprep.subr.bf16.mxu1 %v3542_v30  ;;  %v795_v27 = vld [vmem:[#allocation9 + $0x510] sm:$0xff]  ;;  %v781_v30 = vld [vmem:[#allocation9 + $0x4a0] sm:$0xff]  ;;  %v814_v33 = vld [vmem:[#allocation9 + $0x5a8] sm:$0xff]  ;;  %v3564_v35 = vpack.c.bf16 %v764_v26, %v763_v25 }
  0x7d   :  { %v813_v32 = vld [vmem:[#allocation9 + $0x5a0] sm:$0xff]  ;;  %v626_v34 = vld [vmem:[#allocation6 + $0x48] sm:$0xff]  ;;  %v783_v44 = vld [vmem:[#allocation9 + $0x4b0] sm:$0xff] }
  0x7e   :  { %3513 = vmatpush3.bf16.msra.mxu0 %v3512_v36  ;;  %v628_v36 = vld [vmem:[#allocation6 + $0x58] sm:$0xff]  ;;  %v765_v39 = vld [vmem:[#allocation9 + $0x420] sm:$0xff]  ;;  %v766_v40 = vld [vmem:[#allocation9 + $0x428] sm:$0xff] }
  0x7f   :  { %3545 = vmatpush3.bf16.msra.mxu1 %v3544_v37  ;;  %3515 = vmatprep.subr.bf16.mxu0 %v3514_v38  ;;  %v3596_v37 = vpack.c.bf16 %v796_v29, %v795_v27  ;;  %v3566_v38 = vpack.c.bf16 %v782_v31, %v781_v30  ;;  %v797_v41 = vld [vmem:[#allocation9 + $0x520] sm:$0xff]  ;;  %v798_v43 = vld [vmem:[#allocation9 + $0x528] sm:$0xff]  ;;  %v784_v45 = vld [vmem:[#allocation9 + $0x4b8] sm:$0xff] }
  0x80   :  { %3547 = vmatprep.subr.bf16.mxu1 %v3546_v42  ;;  %v3598_v42 = vpack.c.bf16 %v814_v33, %v813_v32  ;;  %v815_v46 = vld [vmem:[#allocation9 + $0x5b0] sm:$0xff]  ;;  %v816_v47 = vld [vmem:[#allocation9 + $0x5b8] sm:$0xff]  ;;  %v785_v56 = vld [vmem:[#allocation9 + $0x4c0] sm:$0xff] }
  0x81   :  { %v767_v51 = vld [vmem:[#allocation9 + $0x430] sm:$0xff]  ;;  %v768_v52 = vld [vmem:[#allocation9 + $0x438] sm:$0xff]  ;;  %v786_v57 = vld [vmem:[#allocation9 + $0x4c8] sm:$0xff] }
  0x82   :  { %3517 = vmatpush3.bf16.msra.mxu0 %v3516_v48  ;;  %v3568_v48 = vpack.c.bf16 %v766_v40, %v765_v39  ;;  %v799_v53 = vld [vmem:[#allocation9 + $0x530] sm:$0xff]  ;;  %v800_v55 = vld [vmem:[#allocation9 + $0x538] sm:$0xff]  ;;  %v817_v58 = vld [vmem:[#allocation9 + $0x5c0] sm:$0xff] }
  0x83   :  { %3549 = vmatpush3.bf16.msra.mxu1 %v3548_v49  ;;  %3519 = vmatprep.subr.bf16.mxu0 %v3518_v50  ;;  %v3600_v49 = vpack.c.bf16 %v798_v43, %v797_v41  ;;  %v3570_v50 = vpack.c.bf16 %v784_v45, %v783_v44  ;;  %v818_v59 = vld [vmem:[#allocation9 + $0x5c8] sm:$0xff]  ;;  %v769_v63 = vld [vmem:[#allocation9 + $0x440] sm:$0xff]  ;;  %v787_v4 = vld [vmem:[#allocation9 + $0x4d0] sm:$0xff] }
  0x84   :  { %3551 = vmatprep.subr.bf16.mxu1 %v3550_v54  ;;  %v3602_v54 = vpack.c.bf16 %v816_v47, %v815_v46  ;;  %v770_v0 = vld [vmem:[#allocation9 + $0x448] sm:$0xff]  ;;  %v801_v1 = vld [vmem:[#allocation9 + $0x540] sm:$0xff]  ;;  %v788_v5 = vld [vmem:[#allocation9 + $0x4d8] sm:$0xff] }
  0x85   :  { %v802_v3 = vld [vmem:[#allocation9 + $0x548] sm:$0xff]  ;;  %v819_v6 = vld [vmem:[#allocation9 + $0x5d0] sm:$0xff]  ;;  %v820_v7 = vld [vmem:[#allocation9 + $0x5d8] sm:$0xff] }
  0x86   :  { %3521 = vmatpush3.bf16.msra.mxu0 %v3520_v60  ;;  %v3572_v60 = vpack.c.bf16 %v768_v52, %v767_v51  ;;  %v771_v11 = vld [vmem:[#allocation9 + $0x450] sm:$0xff]  ;;  %v772_v12 = vld [vmem:[#allocation9 + $0x458] sm:$0xff]  ;;  %v789_v16 = vld [vmem:[#allocation9 + $0x4e0] sm:$0xff] }
  0x87   :  { %3553 = vmatpush3.bf16.msra.mxu1 %v3552_v61  ;;  %3523 = vmatprep.subr.bf16.mxu0 %v3522_v62  ;;  %v3604_v61 = vpack.c.bf16 %v800_v55, %v799_v53  ;;  %v3574_v62 = vpack.c.bf16 %v786_v57, %v785_v56  ;;  %v803_v13 = vld [vmem:[#allocation9 + $0x550] sm:$0xff]  ;;  %v804_v15 = vld [vmem:[#allocation9 + $0x558] sm:$0xff]  ;;  %v790_v17 = vld [vmem:[#allocation9 + $0x4e8] sm:$0xff] }
  0x88   :  { %3555 = vmatprep.subr.bf16.mxu1 %v3554_v2  ;;  %v3606_v2 = vpack.c.bf16 %v818_v59, %v817_v58  ;;  %v821_v18 = vld [vmem:[#allocation9 + $0x5e0] sm:$0xff]  ;;  %v822_v19 = vld [vmem:[#allocation9 + $0x5e8] sm:$0xff]  ;;  %v792_v29 = vld [vmem:[#allocation9 + $0x4f8] sm:$0xff] }
  0x89   :  { %v805_v25 = vld [vmem:[#allocation9 + $0x560] sm:$0xff]  ;;  %v3614_v26 = vpack.c.bf16 %v822_v19, %v821_v18  ;;  %v806_v27 = vld [vmem:[#allocation9 + $0x568] sm:$0xff]  ;;  %v823_v30 = vld [vmem:[#allocation9 + $0x5f0] sm:$0xff] }
  0x8a   :  { %3525 = vmatpush3.bf16.msra.mxu0 %v3524_v8  ;;  %v3576_v8 = vpack.c.bf16 %v770_v0, %v769_v63  ;;  %v824_v31 = vld [vmem:[#allocation9 + $0x5f8] sm:$0xff]  ;;  %v3616_v33 = vpack.c.bf16 %v806_v27, %v805_v25  ;;  %v841_v40 = vld [vmem:[#allocation9 + $0x680] sm:$0xff]  ;;  %v842_v41 = vld [vmem:[#allocation9 + $0x688] sm:$0xff] }
  0x8b   :  { %3557 = vmatpush3.bf16.msra.mxu1 %v3556_v9  ;;  %3559 = vmatprep.subr.bf16.mxu0 %v3558_v10  ;;  %v3608_v9 = vpack.c.bf16 %v802_v3, %v801_v1  ;;  %v3578_v10 = vpack.c.bf16 %v788_v5, %v787_v4  ;;  %v808_v39 = vld [vmem:[#allocation9 + $0x578] sm:$0xff]  ;;  %v874_v43 = vld [vmem:[#allocation9 + $0x788] sm:$0xff]  ;;  %v3622_v46 = vpack.c.bf16 %v842_v41, %v841_v40  ;;  %v825_v47 = vld [vmem:[#allocation9 + $0x600] sm:$0xff] }
  0x8c   :  { %3591 = vmatprep.subr.bf16.mxu1 %v3590_v14  ;;  %v3610_v14 = vpack.c.bf16 %v820_v7, %v819_v6  ;;  %v858_v51 = vld [vmem:[#allocation9 + $0x708] sm:$0xff]  ;;  %v843_v52 = vld [vmem:[#allocation9 + $0x690] sm:$0xff]  ;;  %v844_v53 = vld [vmem:[#allocation9 + $0x698] sm:$0xff] }
  0x8d   :  { %1094 = vmatmul.mubr.f32.vlgmr.msra.gmra.mrb[2].mxu0 %v621_v20  ;;  %v3580_v20 = vpack.c.bf16 %v772_v12, %v771_v11  ;;  %v876_v55 = vld [vmem:[#allocation9 + $0x798] sm:$0xff]  ;;  %v625_v56 = vld [vmem:[#allocation6 + $0x40] sm:$0xff]  ;;  %v627_v58 = vld [vmem:[#allocation6 + $0x50] sm:$0xff] }
  0x8e   :  { %3561 = vmatpush3.bf16.msra.mxu0 %v3560_v21  ;;  %1164 = vmatmul.mubr.f32.vlgmr.msra.gmra.mrb[2].mxu1 %v623_v22  ;;  %v3612_v21 = vpack.c.bf16 %v804_v15, %v803_v13  ;;  %v3582_v22 = vpack.c.bf16 %v790_v17, %v789_v16  ;;  %v859_v63 = vld [vmem:[#allocation9 + $0x710] sm:$0xff]  ;;  %v860_v1 = vld [vmem:[#allocation9 + $0x718] sm:$0xff]  ;;  %v846_v3 = vld [vmem:[#allocation9 + $0x6a8] sm:$0xff] }
  0x8f   :  { %3593 = vmatpush3.bf16.msra.mxu1 %v3592_v23  ;;  %3563 = vmatprep.subr.bf16.mxu0 %v3562_v24  ;;  %v773_v23 = vld [vmem:[#allocation9 + $0x460] sm:$0xff]  ;;  %v774_v24 = vld [vmem:[#allocation9 + $0x468] sm:$0xff]  ;;  %v847_v16 = vld [vmem:[#allocation9 + $0x6b0] sm:$0xff] }
  0x90   :  { %3595 = vmatprep.subr.bf16.mxu1 %v3594_v28  ;;  %1233 = vmatprep.mubr.f32.mxu0 %v626_v34  ;;  %v791_v28 = vld [vmem:[#allocation9 + $0x4f0] sm:$0xff]  ;;  %v3584_v32 = vpack.c.bf16 %v774_v24, %v773_v23  ;;  %v877_v4 = vld [vmem:[#allocation9 + $0x7a0] sm:$0xff]  ;;  %v878_v5 = vld [vmem:[#allocation9 + $0x7a8] sm:$0xff] }
  0x91   :  { %1303 = vmatprep.mubr.f32.mxu1 %v628_v36  ;;  %v3586_v34 = vpack.c.bf16 %v792_v29, %v791_v28  ;;  %v776_v36 = vld [vmem:[#allocation9 + $0x478] sm:$0xff]  ;;  %v630_v6 = vld [vmem:[#allocation6 + $0x68] sm:$0xff]  ;;  %v829_v11 = vld [vmem:[#allocation9 + $0x620] sm:$0xff] }
  0x92   :  { %3565 = vmatpush3.bf16.msra.mxu0 %v3564_v35  ;;  %v775_v35 = vld [vmem:[#allocation9 + $0x470] sm:$0xff]  ;;  %v830_v12 = vld [vmem:[#allocation9 + $0x628] sm:$0xff]  ;;  %v861_v13 = vld [vmem:[#allocation9 + $0x720] sm:$0xff] }
  0x93   :  { %3597 = vmatpush3.bf16.msra.mxu1 %v3596_v37  ;;  %3567 = vmatprep.subr.bf16.mxu0 %v3566_v38  ;;  %v807_v37 = vld [vmem:[#allocation9 + $0x570] sm:$0xff]  ;;  %v3618_v38 = vpack.c.bf16 %v824_v31, %v823_v30  ;;  %v3588_v44 = vpack.c.bf16 %v776_v36, %v775_v35  ;;  %v862_v15 = vld [vmem:[#allocation9 + $0x728] sm:$0xff]  ;;  %v848_v17 = vld [vmem:[#allocation9 + $0x6b8] sm:$0xff] }
  0x94   :  { %3599 = vmatprep.subr.bf16.mxu1 %v3598_v42  ;;  %v873_v42 = vld [vmem:[#allocation9 + $0x780] sm:$0xff]  ;;  %v3620_v45 = vpack.c.bf16 %v808_v39, %v807_v37  ;;  %v879_v18 = vld [vmem:[#allocation9 + $0x7b0] sm:$0xff]  ;;  %v880_v19 = vld [vmem:[#allocation9 + $0x7b8] sm:$0xff] }
  0x95   :  { %v831_v23 = vld [vmem:[#allocation9 + $0x630] sm:$0xff]  ;;  %v832_v24 = vld [vmem:[#allocation9 + $0x638] sm:$0xff]  ;;  %v849_v28 = vld [vmem:[#allocation9 + $0x6c0] sm:$0xff] }
  0x96   :  { %3569 = vmatpush3.bf16.msra.mxu0 %v3568_v48  ;;  %v826_v48 = vld [vmem:[#allocation9 + $0x608] sm:$0xff]  ;;  %v863_v25 = vld [vmem:[#allocation9 + $0x730] sm:$0xff]  ;;  %v864_v27 = vld [vmem:[#allocation9 + $0x738] sm:$0xff] }
  0x97   :  { %3601 = vmatpush3.bf16.msra.mxu1 %v3600_v49  ;;  %3571 = vmatprep.subr.bf16.mxu0 %v3570_v50  ;;  %v857_v49 = vld [vmem:[#allocation9 + $0x700] sm:$0xff]  ;;  %v3654_v50 = vpack.c.bf16 %v874_v43, %v873_v42  ;;  %v3624_v57 = vpack.c.bf16 %v826_v48, %v825_v47  ;;  %v850_v29 = vld [vmem:[#allocation9 + $0x6c8] sm:$0xff]  ;;  %v851_v40 = vld [vmem:[#allocation9 + $0x6d0] sm:$0xff] }
  0x98   :  { %3603 = vmatprep.subr.bf16.mxu1 %v3602_v54  ;;  %v875_v54 = vld [vmem:[#allocation9 + $0x790] sm:$0xff]  ;;  %v3656_v59 = vpack.c.bf16 %v858_v51, %v857_v49  ;;  %v881_v30 = vld [vmem:[#allocation9 + $0x7c0] sm:$0xff]  ;;  %v882_v31 = vld [vmem:[#allocation9 + $0x7c8] sm:$0xff] }
  0x99   :  { %v3658_v0 = vpack.c.bf16 %v876_v55, %v875_v54  ;;  %v833_v35 = vld [vmem:[#allocation9 + $0x640] sm:$0xff]  ;;  %v834_v36 = vld [vmem:[#allocation9 + $0x648] sm:$0xff]  ;;  %v852_v41 = vld [vmem:[#allocation9 + $0x6d8] sm:$0xff] }
  0x9a   :  { %3573 = vmatpush3.bf16.msra.mxu0 %v3572_v60  ;;  %v3626_v60 = vpack.c.bf16 %v844_v53, %v843_v52  ;;  %v865_v37 = vld [vmem:[#allocation9 + $0x740] sm:$0xff]  ;;  %v866_v39 = vld [vmem:[#allocation9 + $0x748] sm:$0xff]  ;;  %v883_v42 = vld [vmem:[#allocation9 + $0x7d0] sm:$0xff] }
  0x9b   :  { %3605 = vmatpush3.bf16.msra.mxu1 %v3604_v61  ;;  %3575 = vmatprep.subr.bf16.mxu0 %v3574_v62  ;;  %v827_v61 = vld [vmem:[#allocation9 + $0x610] sm:$0xff]  ;;  %v828_v62 = vld [vmem:[#allocation9 + $0x618] sm:$0xff]  ;;  %v853_v52 = vld [vmem:[#allocation9 + $0x6e0] sm:$0xff] }
  0x9c   :  { %3607 = vmatprep.subr.bf16.mxu1 %v3606_v2  ;;  %v845_v2 = vld [vmem:[#allocation9 + $0x6a0] sm:$0xff]  ;;  %v3628_v7 = vpack.c.bf16 %v828_v62, %v827_v61  ;;  %v884_v43 = vld [vmem:[#allocation9 + $0x7d8] sm:$0xff]  ;;  %v835_v47 = vld [vmem:[#allocation9 + $0x650] sm:$0xff] }
  0x9d   :  { %v836_v48 = vld [vmem:[#allocation9 + $0x658] sm:$0xff]  ;;  %v867_v49 = vld [vmem:[#allocation9 + $0x750] sm:$0xff]  ;;  %v854_v53 = vld [vmem:[#allocation9 + $0x6e8] sm:$0xff] }
  0x9e   :  { %3577 = vmatpush3.bf16.msra.mxu0 %v3576_v8  ;;  %v632_v8 = vld [vmem:[#allocation6 + $0x78] sm:$0xff]  ;;  %v885_v54 = vld [vmem:[#allocation9 + $0x7e0] sm:$0xff]  ;;  %v886_v55 = vld [vmem:[#allocation9 + $0x7e8] sm:$0xff] }
  0x9f   :  { %3609 = vmatpush3.bf16.msra.mxu1 %v3608_v9  ;;  %3579 = vmatprep.subr.bf16.mxu0 %v3578_v10  ;;  %v3660_v9 = vpack.c.bf16 %v860_v1, %v859_v63  ;;  %v3630_v10 = vpack.c.bf16 %v846_v3, %v845_v2  ;;  %v868_v51 = vld [vmem:[#allocation9 + $0x758] sm:$0xff]  ;;  %v869_v61 = vld [vmem:[#allocation9 + $0x760] sm:$0xff]  ;;  %v3678_v62 = vpack.c.bf16 %v886_v55, %v885_v54  ;;  %v870_v63 = vld [vmem:[#allocation9 + $0x768] sm:$0xff] }
  0xa0   :  { %3611 = vmatprep.subr.bf16.mxu1 %v3610_v14  ;;  %v3662_v14 = vpack.c.bf16 %v878_v5, %v877_v4  ;;  %v856_v1 = vld [vmem:[#allocation9 + $0x6f8] sm:$0xff]  ;;  %v887_v2 = vld [vmem:[#allocation9 + $0x7f0] sm:$0xff]  ;;  %v3680_v5 = vpack.c.bf16 %v870_v63, %v869_v61 }
  0xa1   :  { %v888_v3 = vld [vmem:[#allocation9 + $0x7f8] sm:$0xff]  ;;  %v159_v54 = vld [vmem:[#allocation8 + $0x1b0] sm:$0xff] }
  0xa2   :  { %3581 = vmatpush3.bf16.msra.mxu0 %v3580_v20  ;;  %v3632_v20 = vpack.c.bf16 %v830_v12, %v829_v11  ;;  %v872_v11 = vld [vmem:[#allocation9 + $0x778] sm:$0xff]  ;;  %v121_v12 = vld [vmem:[#allocation8 + $0x80] sm:$0xff]  ;;  %v143_v61 = vld [vmem:[#allocation8 + $0x130] sm:$0xff] }
  0xa3   :  { %3613 = vmatpush3.bf16.msra.mxu1 %v3612_v21  ;;  %3583 = vmatprep.subr.bf16.mxu0 %v3582_v22  ;;  %v3664_v21 = vpack.c.bf16 %v862_v15, %v861_v13  ;;  %v3634_v22 = vpack.c.bf16 %v848_v17, %v847_v16  ;;  %v122_v13 = vld [vmem:[#allocation8 + $0x88] sm:$0xff]  ;;  %v160_v55 = vld [vmem:[#allocation8 + $0x1b8] sm:$0xff] }
  0xa4   :  { %3615 = vmatprep.subr.bf16.mxu1 %v3614_v26  ;;  %v3666_v26 = vpack.c.bf16 %v880_v19, %v879_v18  ;;  %v154_v15 = vld [vmem:[#allocation8 + $0x188] sm:$0xff]  ;;  %v3686_v18 = vpack.c.bf16 %v122_v13, %v121_v12  ;;  %v105_v19 = vld [vmem:[#allocation8] sm:$0xff]  ;;  %v144_v63 = vld [vmem:[#allocation8 + $0x138] sm:$0xff] }
  0xa5   :  { %v131_v12 = vld [vmem:[#allocation8 + $0xd0] sm:$0xff]  ;;  %v132_v13 = vld [vmem:[#allocation8 + $0xd8] sm:$0xff] }
  0xa6   :  { %3585 = vmatpush3.bf16.msra.mxu0 %v3584_v32  ;;  %v3636_v32 = vpack.c.bf16 %v832_v24, %v831_v23  ;;  %v138_v23 = vld [vmem:[#allocation8 + $0x108] sm:$0xff]  ;;  %v123_v24 = vld [vmem:[#allocation8 + $0x90] sm:$0xff] }
  0xa7   :  { %3617 = vmatpush3.bf16.msra.mxu1 %v3616_v33  ;;  %3587 = vmatprep.subr.bf16.mxu0 %v3586_v34  ;;  %v3668_v33 = vpack.c.bf16 %v864_v27, %v863_v25  ;;  %v3638_v34 = vpack.c.bf16 %v850_v29, %v849_v28  ;;  %v124_v25 = vld [vmem:[#allocation8 + $0x98] sm:$0xff]  ;;  %v629_v28 = vld [vmem:[#allocation6 + $0x60] sm:$0xff] }
  0xa8   :  { %3619 = vmatprep.subr.bf16.mxu1 %v3618_v38  ;;  %v3670_v38 = vpack.c.bf16 %v882_v31, %v881_v30  ;;  %v156_v27 = vld [vmem:[#allocation8 + $0x198] sm:$0xff]  ;;  %v631_v30 = vld [vmem:[#allocation6 + $0x70] sm:$0xff] }
  0xaa   :  { %3589 = vmatpush3.bf16.msra.mxu0 %v3588_v44  ;;  %v3640_v44 = vpack.c.bf16 %v834_v36, %v833_v35  ;;  %v139_v35 = vld [vmem:[#allocation8 + $0x110] sm:$0xff] }
  0xab   :  { %3621 = vmatpush3.bf16.msra.mxu1 %v3620_v45  ;;  %3623 = vmatprep.subr.bf16.mxu0 %v3622_v46  ;;  %v3672_v45 = vpack.c.bf16 %v866_v39, %v865_v37  ;;  %v3642_v46 = vpack.c.bf16 %v852_v41, %v851_v40  ;;  %v140_v37 = vld [vmem:[#allocation8 + $0x118] sm:$0xff]  ;;  %v126_v39 = vld [vmem:[#allocation8 + $0xa8] sm:$0xff]  ;;  %v157_v40 = vld [vmem:[#allocation8 + $0x1a0] sm:$0xff] }
  0xac   :  { %3655 = vmatprep.subr.bf16.mxu1 %v3654_v50  ;;  %v3674_v50 = vpack.c.bf16 %v884_v43, %v883_v42  ;;  %v158_v41 = vld [vmem:[#allocation8 + $0x1a8] sm:$0xff] }
  0xad   :  { %1234 = vmatmul.mubr.f32.vlgmr.msra.gmra.mrb[4].mxu0 %v625_v56  ;;  %v3644_v56 = vpack.c.bf16 %v836_v48, %v835_v47  ;;  %v74_v42 = vld [vmem:[#allocation3 + $0x8] sm:$0xff]  ;;  %v109_v47 = vld [vmem:[#allocation8 + $0x20] sm:$0xff] }
  0xae   :  { %3625 = vmatpush3.bf16.msra.mxu0 %v3624_v57  ;;  %1304 = vmatmul.mubr.f32.vlgmr.msra.gmra.mrb[4].mxu1 %v627_v58  ;;  %v3676_v57 = vpack.c.bf16 %v868_v51, %v867_v49  ;;  %v3646_v58 = vpack.c.bf16 %v854_v53, %v853_v52  ;;  %v110_v48 = vld [vmem:[#allocation8 + $0x28] sm:$0xff]  ;;  %v141_v49 = vld [vmem:[#allocation8 + $0x120] sm:$0xff]  ;;  %v127_v52 = vld [vmem:[#allocation8 + $0xb0] sm:$0xff] }
  0xaf   :  { %3657 = vmatpush3.bf16.msra.mxu1 %v3656_v59  ;;  %3627 = vmatprep.subr.bf16.mxu0 %v3626_v60  ;;  %v837_v59 = vld [vmem:[#allocation9 + $0x660] sm:$0xff]  ;;  %v838_v60 = vld [vmem:[#allocation9 + $0x668] sm:$0xff]  ;;  %v128_v53 = vld [vmem:[#allocation8 + $0xb8] sm:$0xff] }
  0xb0   :  { %3659 = vmatprep.subr.bf16.mxu1 %v3658_v0  ;;  %1373 = vmatprep.mubr.f32.mxu0 %v630_v6  ;;  %v855_v0 = vld [vmem:[#allocation9 + $0x6f0] sm:$0xff]  ;;  %v3648_v4 = vpack.c.bf16 %v838_v60, %v837_v59  ;;  %v142_v51 = vld [vmem:[#allocation8 + $0x128] sm:$0xff]  ;;  %v112_v60 = vld [vmem:[#allocation8 + $0x38] sm:$0xff] }
  0xb1   :  { %1443 = vmatprep.mubr.f32.mxu1 %v632_v8  ;;  %v3650_v6 = vpack.c.bf16 %v856_v1, %v855_v0  ;;  %v840_v8 = vld [vmem:[#allocation9 + $0x678] sm:$0xff]  ;;  %v111_v59 = vld [vmem:[#allocation8 + $0x30] sm:$0xff]  ;;  %v129_v0 = vld [vmem:[#allocation8 + $0xc0] sm:$0xff] }
  0xb2   :  { %3629 = vmatpush3.bf16.msra.mxu0 %v3628_v7  ;;  %v839_v7 = vld [vmem:[#allocation9 + $0x670] sm:$0xff]  ;;  %v130_v1 = vld [vmem:[#allocation8 + $0xc8] sm:$0xff] }
  0xb3   :  { %3661 = vmatpush3.bf16.msra.mxu1 %v3660_v9  ;;  %3631 = vmatprep.subr.bf16.mxu0 %v3630_v10  ;;  %v871_v9 = vld [vmem:[#allocation9 + $0x770] sm:$0xff]  ;;  %v3682_v10 = vpack.c.bf16 %v888_v3, %v887_v2  ;;  %v3652_v16 = vpack.c.bf16 %v840_v8, %v839_v7  ;;  %v161_v2 = vld [vmem:[#allocation8 + $0x1c0] sm:$0xff]  ;;  %v162_v3 = vld [vmem:[#allocation8 + $0x1c8] sm:$0xff] }
  0xb4   :  { %3663 = vmatprep.subr.bf16.mxu1 %v3662_v14  ;;  %v153_v14 = vld [vmem:[#allocation8 + $0x180] sm:$0xff]  ;;  %v3684_v17 = vpack.c.bf16 %v872_v11, %v871_v9  ;;  %v114_v8 = vld [vmem:[#allocation8 + $0x48] sm:$0xff] }
  0xb5   :  { %v113_v7 = vld [vmem:[#allocation8 + $0x40] sm:$0xff]  ;;  %v146_v11 = vld [vmem:[#allocation8 + $0x148] sm:$0xff] }
  0xb6   :  { %3633 = vmatpush3.bf16.msra.mxu0 %v3632_v20  ;;  %v106_v20 = vld [vmem:[#allocation8 + $0x8] sm:$0xff]  ;;  %v145_v9 = vld [vmem:[#allocation8 + $0x140] sm:$0xff] }
  0xb7   :  { %3665 = vmatpush3.bf16.msra.mxu1 %v3664_v21  ;;  %3635 = vmatprep.subr.bf16.mxu0 %v3634_v22  ;;  %v137_v21 = vld [vmem:[#allocation8 + $0x100] sm:$0xff]  ;;  %v3718_v22 = vpack.c.bf16 %v154_v15, %v153_v14  ;;  %v3688_v29 = vpack.c.bf16 %v106_v20, %v105_v19  ;;  %v163_v14 = vld [vmem:[#allocation8 + $0x1d0] sm:$0xff]  ;;  %v164_v15 = vld [vmem:[#allocation8 + $0x1d8] sm:$0xff] }
  0xb8   :  { %3667 = vmatprep.subr.bf16.mxu1 %v3666_v26  ;;  %v155_v26 = vld [vmem:[#allocation8 + $0x190] sm:$0xff]  ;;  %v3720_v31 = vpack.c.bf16 %v138_v23, %v137_v21  ;;  %v116_v20 = vld [vmem:[#allocation8 + $0x58] sm:$0xff] }
  0xb9   :  { %v3722_v36 = vpack.c.bf16 %v156_v27, %v155_v26  ;;  %v115_v19 = vld [vmem:[#allocation8 + $0x50] sm:$0xff]  ;;  %v148_v23 = vld [vmem:[#allocation8 + $0x158] sm:$0xff]  ;;  %v165_v26 = vld [vmem:[#allocation8 + $0x1e0] sm:$0xff] }
  0xba   :  { %3637 = vmatpush3.bf16.msra.mxu0 %v3636_v32  ;;  %v3690_v32 = vpack.c.bf16 %v124_v25, %v123_v24  ;;  %v147_v21 = vld [vmem:[#allocation8 + $0x150] sm:$0xff]  ;;  %v133_v24 = vld [vmem:[#allocation8 + $0xe0] sm:$0xff]  ;;  %v134_v25 = vld [vmem:[#allocation8 + $0xe8] sm:$0xff] }
  0xbb   :  { %3669 = vmatpush3.bf16.msra.mxu1 %v3668_v33  ;;  %3639 = vmatprep.subr.bf16.mxu0 %v3638_v34  ;;  %v107_v33 = vld [vmem:[#allocation8 + $0x10] sm:$0xff]  ;;  %v108_v34 = vld [vmem:[#allocation8 + $0x18] sm:$0xff]  ;;  %v166_v27 = vld [vmem:[#allocation8 + $0x1e8] sm:$0xff] }
  0xbc   :  { %3671 = vmatprep.subr.bf16.mxu1 %v3670_v38  ;;  %v125_v38 = vld [vmem:[#allocation8 + $0xa0] sm:$0xff]  ;;  %v3692_v43 = vpack.c.bf16 %v108_v34, %v107_v33  ;;  %v3742_v34 = vpack.c.bf16 %v166_v27, %v165_v26  ;;  %v223_v26 = vld [vmem:[#allocation8 + $0x3b0] sm:$0xff]  ;;  %v224_v27 = vld [vmem:[#allocation8 + $0x3b8] sm:$0xff] }
  0xbd   :  { %v149_v33 = vld [vmem:[#allocation8 + $0x160] sm:$0xff] }
  0xbe   :  { %3641 = vmatpush3.bf16.msra.mxu0 %v3640_v44  ;;  %v76_v44 = vld [vmem:[#allocation3 + $0x18] sm:$0xff] }
  0xbf   :  { %3673 = vmatpush3.bf16.msra.mxu1 %v3672_v45  ;;  %3643 = vmatprep.subr.bf16.mxu0 %v3642_v46  ;;  %v3724_v45 = vpack.c.bf16 %v140_v37, %v139_v35  ;;  %v3694_v46 = vpack.c.bf16 %v126_v39, %v125_v38  ;;  %v150_v35 = vld [vmem:[#allocation8 + $0x168] sm:$0xff]  ;;  %v136_v37 = vld [vmem:[#allocation8 + $0xf8] sm:$0xff]  ;;  %v167_v38 = vld [vmem:[#allocation8 + $0x1f0] sm:$0xff] }
  0xc0   :  { %3675 = vmatprep.subr.bf16.mxu1 %v3674_v50  ;;  %v3726_v50 = vpack.c.bf16 %v158_v41, %v157_v40  ;;  %v168_v39 = vld [vmem:[#allocation8 + $0x1f8] sm:$0xff]  ;;  %v3744_v41 = vpack.c.bf16 %v150_v35, %v149_v33  ;;  %v207_v33 = vld [vmem:[#allocation8 + $0x330] sm:$0xff] }
  0xc1   :  { %v208_v35 = vld [vmem:[#allocation8 + $0x338] sm:$0xff] }
  0xc2   :  { %3645 = vmatpush3.bf16.msra.mxu0 %v3644_v56  ;;  %v3696_v56 = vpack.c.bf16 %v110_v48, %v109_v47  ;;  %v152_v47 = vld [vmem:[#allocation8 + $0x178] sm:$0xff]  ;;  %v185_v48 = vld [vmem:[#allocation8 + $0x280] sm:$0xff] }
  0xc3   :  { %3677 = vmatpush3.bf16.msra.mxu1 %v3676_v57  ;;  %3647 = vmatprep.subr.bf16.mxu0 %v3646_v58  ;;  %v3728_v57 = vpack.c.bf16 %v142_v51, %v141_v49  ;;  %v3698_v58 = vpack.c.bf16 %v128_v53, %v127_v52  ;;  %v186_v49 = vld [vmem:[#allocation8 + $0x288] sm:$0xff] }
  0xc4   :  { %3679 = vmatprep.subr.bf16.mxu1 %v3678_v62  ;;  %v3730_v62 = vpack.c.bf16 %v160_v55, %v159_v54  ;;  %v218_v51 = vld [vmem:[#allocation8 + $0x388] sm:$0xff]  ;;  %v3750_v54 = vpack.c.bf16 %v186_v49, %v185_v48  ;;  %v169_v55 = vld [vmem:[#allocation8 + $0x200] sm:$0xff]  ;;  %v195_v48 = vld [vmem:[#allocation8 + $0x2d0] sm:$0xff] }
  0xc5   :  { %v196_v49 = vld [vmem:[#allocation8 + $0x2d8] sm:$0xff] }
  0xc6   :  { %3649 = vmatpush3.bf16.msra.mxu0 %v3648_v4  ;;  %v3700_v4 = vpack.c.bf16 %v112_v60, %v111_v59  ;;  %v202_v59 = vld [vmem:[#allocation8 + $0x308] sm:$0xff]  ;;  %v187_v60 = vld [vmem:[#allocation8 + $0x290] sm:$0xff] }
  0xc7   :  { %3681 = vmatpush3.bf16.msra.mxu1 %v3680_v5  ;;  %3651 = vmatprep.subr.bf16.mxu0 %v3650_v6  ;;  %v3732_v5 = vpack.c.bf16 %v144_v63, %v143_v61  ;;  %v3702_v6 = vpack.c.bf16 %v130_v1, %v129_v0  ;;  %v188_v61 = vld [vmem:[#allocation8 + $0x298] sm:$0xff]  ;;  %v73_v0 = vld [vmem:[#allocation3] sm:$0xff] }
  0xc8   :  { %3683 = vmatprep.subr.bf16.mxu1 %v3682_v10  ;;  %v3734_v10 = vpack.c.bf16 %v162_v3, %v161_v2  ;;  %v220_v63 = vld [vmem:[#allocation8 + $0x398] sm:$0xff]  ;;  %v75_v2 = vld [vmem:[#allocation3 + $0x10] sm:$0xff] }
  0xca   :  { %3653 = vmatpush3.bf16.msra.mxu0 %v3652_v16  ;;  %v3704_v16 = vpack.c.bf16 %v114_v8, %v113_v7  ;;  %v203_v7 = vld [vmem:[#allocation8 + $0x310] sm:$0xff] }
  0xcb   :  { %3685 = vmatpush3.bf16.msra.mxu1 %v3684_v17  ;;  %3687 = vmatprep.subr.bf16.mxu0 %v3686_v18  ;;  %v3736_v17 = vpack.c.bf16 %v146_v11, %v145_v9  ;;  %v3706_v18 = vpack.c.bf16 %v132_v13, %v131_v12  ;;  %v204_v9 = vld [vmem:[#allocation8 + $0x318] sm:$0xff]  ;;  %v190_v11 = vld [vmem:[#allocation8 + $0x2a8] sm:$0xff]  ;;  %v221_v12 = vld [vmem:[#allocation8 + $0x3a0] sm:$0xff] }
  0xcc   :  { %3719 = vmatprep.subr.bf16.mxu1 %v3718_v22  ;;  %v3738_v22 = vpack.c.bf16 %v164_v15, %v163_v14  ;;  %v222_v13 = vld [vmem:[#allocation8 + $0x3a8] sm:$0xff] }
  0xcd   :  { %1374 = vmatmul.mubr.f32.vlgmr.msra.gmra.mrb[6].mxu0 %v629_v28  ;;  %v3708_v28 = vpack.c.bf16 %v116_v20, %v115_v19  ;;  %v78_v14 = vld [vmem:[#allocation3 + $0x28] sm:$0xff]  ;;  %v173_v19 = vld [vmem:[#allocation8 + $0x220] sm:$0xff] }
  0xce   :  { %3689 = vmatpush3.bf16.msra.mxu0 %v3688_v29  ;;  %1444 = vmatmul.mubr.f32.vlgmr.msra.gmra.mrb[6].mxu1 %v631_v30  ;;  %v3740_v29 = vpack.c.bf16 %v148_v23, %v147_v21  ;;  %v3710_v30 = vpack.c.bf16 %v134_v25, %v133_v24  ;;  %v174_v20 = vld [vmem:[#allocation8 + $0x228] sm:$0xff]  ;;  %v205_v21 = vld [vmem:[#allocation8 + $0x320] sm:$0xff]  ;;  %v191_v24 = vld [vmem:[#allocation8 + $0x2b0] sm:$0xff] }
  0xcf   :  { %3721 = vmatpush3.bf16.msra.mxu1 %v3720_v31  ;;  %3691 = vmatprep.subr.bf16.mxu0 %v3690_v32  ;;  %v117_v31 = vld [vmem:[#allocation8 + $0x60] sm:$0xff]  ;;  %v118_v32 = vld [vmem:[#allocation8 + $0x68] sm:$0xff]  ;;  %v192_v25 = vld [vmem:[#allocation8 + $0x2b8] sm:$0xff] }
  0xd0   :  { %3723 = vmatprep.subr.bf16.mxu1 %v3722_v36  ;;  %1513 = vmatprep.mubr.f32.mxu0 %v74_v42  ;;  %v135_v36 = vld [vmem:[#allocation8 + $0xf0] sm:$0xff]  ;;  %v3712_v40 = vpack.c.bf16 %v118_v32, %v117_v31  ;;  %v206_v23 = vld [vmem:[#allocation8 + $0x328] sm:$0xff]  ;;  %v176_v32 = vld [vmem:[#allocation8 + $0x238] sm:$0xff] }
  0xd1   :  { %1583 = vmatprep.mubr.f32.mxu1 %v76_v44  ;;  %v3714_v42 = vpack.c.bf16 %v136_v37, %v135_v36  ;;  %v120_v44 = vld [vmem:[#allocation8 + $0x78] sm:$0xff]  ;;  %v175_v31 = vld [vmem:[#allocation8 + $0x230] sm:$0xff]  ;;  %v193_v36 = vld [vmem:[#allocation8 + $0x2c0] sm:$0xff] }
  0xd2   :  { %3693 = vmatpush3.bf16.msra.mxu0 %v3692_v43  ;;  %v119_v43 = vld [vmem:[#allocation8 + $0x70] sm:$0xff]  ;;  %v194_v37 = vld [vmem:[#allocation8 + $0x2c8] sm:$0xff] }
  0xd3   :  { %3725 = vmatpush3.bf16.msra.mxu1 %v3724_v45  ;;  %3695 = vmatprep.subr.bf16.mxu0 %v3694_v46  ;;  %v151_v45 = vld [vmem:[#allocation8 + $0x170] sm:$0xff]  ;;  %v3746_v46 = vpack.c.bf16 %v168_v39, %v167_v38  ;;  %v3716_v52 = vpack.c.bf16 %v120_v44, %v119_v43  ;;  %v225_v38 = vld [vmem:[#allocation8 + $0x3c0] sm:$0xff]  ;;  %v226_v39 = vld [vmem:[#allocation8 + $0x3c8] sm:$0xff] }
  0xd4   :  { %3727 = vmatprep.subr.bf16.mxu1 %v3726_v50  ;;  %v217_v50 = vld [vmem:[#allocation8 + $0x380] sm:$0xff]  ;;  %v3748_v53 = vpack.c.bf16 %v152_v47, %v151_v45  ;;  %v178_v44 = vld [vmem:[#allocation8 + $0x248] sm:$0xff] }
  0xd5   :  { %v177_v43 = vld [vmem:[#allocation8 + $0x240] sm:$0xff]  ;;  %v210_v47 = vld [vmem:[#allocation8 + $0x348] sm:$0xff] }
  0xd6   :  { %3697 = vmatpush3.bf16.msra.mxu0 %v3696_v56  ;;  %v170_v56 = vld [vmem:[#allocation8 + $0x208] sm:$0xff]  ;;  %v209_v45 = vld [vmem:[#allocation8 + $0x340] sm:$0xff] }
  0xd7   :  { %3729 = vmatpush3.bf16.msra.mxu1 %v3728_v57  ;;  %3699 = vmatprep.subr.bf16.mxu0 %v3698_v58  ;;  %v201_v57 = vld [vmem:[#allocation8 + $0x300] sm:$0xff]  ;;  %v3782_v58 = vpack.c.bf16 %v218_v51, %v217_v50  ;;  %v3752_v1 = vpack.c.bf16 %v170_v56, %v169_v55  ;;  %v227_v50 = vld [vmem:[#allocation8 + $0x3d0] sm:$0xff]  ;;  %v228_v51 = vld [vmem:[#allocation8 + $0x3d8] sm:$0xff] }
  0xd8   :  { %3731 = vmatprep.subr.bf16.mxu1 %v3730_v62  ;;  %v219_v62 = vld [vmem:[#allocation8 + $0x390] sm:$0xff]  ;;  %v3784_v3 = vpack.c.bf16 %v202_v59, %v201_v57  ;;  %v180_v56 = vld [vmem:[#allocation8 + $0x258] sm:$0xff] }
  0xd9   :  { %v3786_v8 = vpack.c.bf16 %v220_v63, %v219_v62  ;;  %v179_v55 = vld [vmem:[#allocation8 + $0x250] sm:$0xff]  ;;  %v212_v59 = vld [vmem:[#allocation8 + $0x358] sm:$0xff]  ;;  %v229_v62 = vld [vmem:[#allocation8 + $0x3e0] sm:$0xff] }
  0xda   :  { %3701 = vmatpush3.bf16.msra.mxu0 %v3700_v4  ;;  %v3754_v4 = vpack.c.bf16 %v188_v61, %v187_v60  ;;  %v211_v57 = vld [vmem:[#allocation8 + $0x350] sm:$0xff]  ;;  %v197_v60 = vld [vmem:[#allocation8 + $0x2e0] sm:$0xff]  ;;  %v198_v61 = vld [vmem:[#allocation8 + $0x2e8] sm:$0xff] }
  0xdb   :  { %3733 = vmatpush3.bf16.msra.mxu1 %v3732_v5  ;;  %3703 = vmatprep.subr.bf16.mxu0 %v3702_v6  ;;  %v171_v5 = vld [vmem:[#allocation8 + $0x210] sm:$0xff]  ;;  %v172_v6 = vld [vmem:[#allocation8 + $0x218] sm:$0xff]  ;;  %v230_v63 = vld [vmem:[#allocation8 + $0x3e8] sm:$0xff] }
  0xdc   :  { %3735 = vmatprep.subr.bf16.mxu1 %v3734_v10  ;;  %v189_v10 = vld [vmem:[#allocation8 + $0x2a0] sm:$0xff]  ;;  %v3756_v15 = vpack.c.bf16 %v172_v6, %v171_v5  ;;  %v3806_v6 = vpack.c.bf16 %v230_v63, %v229_v62  ;;  %v287_v62 = vld [vmem:[#allocation8 + $0x5b0] sm:$0xff]  ;;  %v288_v63 = vld [vmem:[#allocation8 + $0x5b8] sm:$0xff] }
  0xdd   :  { %v213_v5 = vld [vmem:[#allocation8 + $0x360] sm:$0xff] }
  0xde   :  { %3705 = vmatpush3.bf16.msra.mxu0 %v3704_v16  ;;  %v80_v16 = vld [vmem:[#allocation3 + $0x38] sm:$0xff] }
  0xdf   :  { %3737 = vmatpush3.bf16.msra.mxu1 %v3736_v17  ;;  %3707 = vmatprep.subr.bf16.mxu0 %v3706_v18  ;;  %v3788_v17 = vpack.c.bf16 %v204_v9, %v203_v7  ;;  %v3758_v18 = vpack.c.bf16 %v190_v11, %v189_v10  ;;  %v214_v7 = vld [vmem:[#allocation8 + $0x368] sm:$0xff]  ;;  %v200_v9 = vld [vmem:[#allocation8 + $0x2f8] sm:$0xff]  ;;  %v231_v10 = vld [vmem:[#allocation8 + $0x3f0] sm:$0xff] }
  0xe0   :  { %3739 = vmatprep.subr.bf16.mxu1 %v3738_v22  ;;  %v3790_v22 = vpack.c.bf16 %v222_v13, %v221_v12  ;;  %v232_v11 = vld [vmem:[#allocation8 + $0x3f8] sm:$0xff]  ;;  %v3808_v13 = vpack.c.bf16 %v214_v7, %v213_v5  ;;  %v271_v5 = vld [vmem:[#allocation8 + $0x530] sm:$0xff] }
  0xe1   :  { %v272_v7 = vld [vmem:[#allocation8 + $0x538] sm:$0xff] }
  0xe2   :  { %3709 = vmatpush3.bf16.msra.mxu0 %v3708_v28  ;;  %v3760_v28 = vpack.c.bf16 %v174_v20, %v173_v19  ;;  %v216_v19 = vld [vmem:[#allocation8 + $0x378] sm:$0xff]  ;;  %v249_v20 = vld [vmem:[#allocation8 + $0x480] sm:$0xff] }
  0xe3   :  { %3741 = vmatpush3.bf16.msra.mxu1 %v3740_v29  ;;  %3711 = vmatprep.subr.bf16.mxu0 %v3710_v30  ;;  %v3792_v29 = vpack.c.bf16 %v206_v23, %v205_v21  ;;  %v3762_v30 = vpack.c.bf16 %v192_v25, %v191_v24  ;;  %v250_v21 = vld [vmem:[#allocation8 + $0x488] sm:$0xff] }
  0xe4   :  { %3743 = vmatprep.subr.bf16.mxu1 %v3742_v34  ;;  %v3794_v34 = vpack.c.bf16 %v224_v27, %v223_v26  ;;  %v282_v23 = vld [vmem:[#allocation8 + $0x588] sm:$0xff]  ;;  %v3814_v26 = vpack.c.bf16 %v250_v21, %v249_v20  ;;  %v233_v27 = vld [vmem:[#allocation8 + $0x400] sm:$0xff]  ;;  %v259_v20 = vld [vmem:[#allocation8 + $0x4d0] sm:$0xff] }
  0xe5   :  { %v260_v21 = vld [vmem:[#allocation8 + $0x4d8] sm:$0xff] }
  0xe6   :  { %3713 = vmatpush3.bf16.msra.mxu0 %v3712_v40  ;;  %v3764_v40 = vpack.c.bf16 %v176_v32, %v175_v31  ;;  %v266_v31 = vld [vmem:[#allocation8 + $0x508] sm:$0xff]  ;;  %v251_v32 = vld [vmem:[#allocation8 + $0x490] sm:$0xff] }
  0xe7   :  { %3745 = vmatpush3.bf16.msra.mxu1 %v3744_v41  ;;  %3715 = vmatprep.subr.bf16.mxu0 %v3714_v42  ;;  %v3796_v41 = vpack.c.bf16 %v208_v35, %v207_v33  ;;  %v3766_v42 = vpack.c.bf16 %v194_v37, %v193_v36  ;;  %v252_v33 = vld [vmem:[#allocation8 + $0x498] sm:$0xff]  ;;  %v77_v36 = vld [vmem:[#allocation3 + $0x20] sm:$0xff] }
  0xe8   :  { %3747 = vmatprep.subr.bf16.mxu1 %v3746_v46  ;;  %v3798_v46 = vpack.c.bf16 %v226_v39, %v225_v38  ;;  %v284_v35 = vld [vmem:[#allocation8 + $0x598] sm:$0xff]  ;;  %v79_v38 = vld [vmem:[#allocation3 + $0x30] sm:$0xff] }
  0xea   :  { %3717 = vmatpush3.bf16.msra.mxu0 %v3716_v52  ;;  %v3768_v52 = vpack.c.bf16 %v178_v44, %v177_v43  ;;  %v267_v43 = vld [vmem:[#allocation8 + $0x510] sm:$0xff] }
  0xeb   :  { %3749 = vmatpush3.bf16.msra.mxu1 %v3748_v53  ;;  %3751 = vmatprep.subr.bf16.mxu0 %v3750_v54  ;;  %v3800_v53 = vpack.c.bf16 %v210_v47, %v209_v45  ;;  %v3770_v54 = vpack.c.bf16 %v196_v49, %v195_v48  ;;  %v268_v45 = vld [vmem:[#allocation8 + $0x518] sm:$0xff]  ;;  %v254_v47 = vld [vmem:[#allocation8 + $0x4a8] sm:$0xff]  ;;  %v285_v48 = vld [vmem:[#allocation8 + $0x5a0] sm:$0xff] }
  0xec   :  { %3783 = vmatprep.subr.bf16.mxu1 %v3782_v58  ;;  %v3802_v58 = vpack.c.bf16 %v228_v51, %v227_v50  ;;  %v286_v49 = vld [vmem:[#allocation8 + $0x5a8] sm:$0xff] }
  0xed   :  { %1514 = vmatmul.mubr.f32.vlgmr.msra.gmra.mrb[8].mxu0 %v73_v0  ;;  %v3772_v0 = vpack.c.bf16 %v180_v56, %v179_v55  ;;  %v82_v50 = vld [vmem:[#allocation3 + $0x48] sm:$0xff]  ;;  %v237_v55 = vld [vmem:[#allocation8 + $0x420] sm:$0xff] }
  0xee   :  { %3753 = vmatpush3.bf16.msra.mxu0 %v3752_v1  ;;  %1584 = vmatmul.mubr.f32.vlgmr.msra.gmra.mrb[8].mxu1 %v75_v2  ;;  %v3804_v1 = vpack.c.bf16 %v212_v59, %v211_v57  ;;  %v3774_v2 = vpack.c.bf16 %v198_v61, %v197_v60  ;;  %v238_v56 = vld [vmem:[#allocation8 + $0x428] sm:$0xff]  ;;  %v269_v57 = vld [vmem:[#allocation8 + $0x520] sm:$0xff]  ;;  %v255_v60 = vld [vmem:[#allocation8 + $0x4b0] sm:$0xff] }
  0xef   :  { %3785 = vmatpush3.bf16.msra.mxu1 %v3784_v3  ;;  %3755 = vmatprep.subr.bf16.mxu0 %v3754_v4  ;;  %v181_v3 = vld [vmem:[#allocation8 + $0x260] sm:$0xff]  ;;  %v182_v4 = vld [vmem:[#allocation8 + $0x268] sm:$0xff]  ;;  %v256_v61 = vld [vmem:[#allocation8 + $0x4b8] sm:$0xff] }
  0xf0   :  { %3787 = vmatprep.subr.bf16.mxu1 %v3786_v8  ;;  %1653 = vmatprep.mubr.f32.mxu0 %v78_v14  ;;  %v199_v8 = vld [vmem:[#allocation8 + $0x2f0] sm:$0xff]  ;;  %v3776_v12 = vpack.c.bf16 %v182_v4, %v181_v3  ;;  %v270_v59 = vld [vmem:[#allocation8 + $0x528] sm:$0xff]  ;;  %v240_v4 = vld [vmem:[#allocation8 + $0x438] sm:$0xff] }
  0xf1   :  { %1723 = vmatprep.mubr.f32.mxu1 %v80_v16  ;;  %v3778_v14 = vpack.c.bf16 %v200_v9, %v199_v8  ;;  %v184_v16 = vld [vmem:[#allocation8 + $0x278] sm:$0xff]  ;;  %v239_v3 = vld [vmem:[#allocation8 + $0x430] sm:$0xff]  ;;  %v257_v8 = vld [vmem:[#allocation8 + $0x4c0] sm:$0xff] }
  0xf2   :  { %3757 = vmatpush3.bf16.msra.mxu0 %v3756_v15  ;;  %v183_v15 = vld [vmem:[#allocation8 + $0x270] sm:$0xff]  ;;  %v258_v9 = vld [vmem:[#allocation8 + $0x4c8] sm:$0xff] }
  0xf3   :  { %3789 = vmatpush3.bf16.msra.mxu1 %v3788_v17  ;;  %3759 = vmatprep.subr.bf16.mxu0 %v3758_v18  ;;  %v215_v17 = vld [vmem:[#allocation8 + $0x370] sm:$0xff]  ;;  %v3810_v18 = vpack.c.bf16 %v232_v11, %v231_v10  ;;  %v3780_v24 = vpack.c.bf16 %v184_v16, %v183_v15  ;;  %v289_v10 = vld [vmem:[#allocation8 + $0x5c0] sm:$0xff]  ;;  %v290_v11 = vld [vmem:[#allocation8 + $0x5c8] sm:$0xff] }
  0xf4   :  { %3791 = vmatprep.subr.bf16.mxu1 %v3790_v22  ;;  %v281_v22 = vld [vmem:[#allocation8 + $0x580] sm:$0xff]  ;;  %v3812_v25 = vpack.c.bf16 %v216_v19, %v215_v17  ;;  %v242_v16 = vld [vmem:[#allocation8 + $0x448] sm:$0xff] }
  0xf5   :  { %v241_v15 = vld [vmem:[#allocation8 + $0x440] sm:$0xff]  ;;  %v274_v19 = vld [vmem:[#allocation8 + $0x548] sm:$0xff] }
  0xf6   :  { %3761 = vmatpush3.bf16.msra.mxu0 %v3760_v28  ;;  %v234_v28 = vld [vmem:[#allocation8 + $0x408] sm:$0xff]  ;;  %v273_v17 = vld [vmem:[#allocation8 + $0x540] sm:$0xff] }
  0xf7   :  { %3793 = vmatpush3.bf16.msra.mxu1 %v3792_v29  ;;  %3763 = vmatprep.subr.bf16.mxu0 %v3762_v30  ;;  %v265_v29 = vld [vmem:[#allocation8 + $0x500] sm:$0xff]  ;;  %v3846_v30 = vpack.c.bf16 %v282_v23, %v281_v22  ;;  %v3816_v37 = vpack.c.bf16 %v234_v28, %v233_v27  ;;  %v291_v22 = vld [vmem:[#allocation8 + $0x5d0] sm:$0xff]  ;;  %v292_v23 = vld [vmem:[#allocation8 + $0x5d8] sm:$0xff] }
  0xf8   :  { %3795 = vmatprep.subr.bf16.mxu1 %v3794_v34  ;;  %v283_v34 = vld [vmem:[#allocation8 + $0x590] sm:$0xff]  ;;  %v3848_v39 = vpack.c.bf16 %v266_v31, %v265_v29  ;;  %v244_v28 = vld [vmem:[#allocation8 + $0x458] sm:$0xff] }
  0xf9   :  { %v3850_v44 = vpack.c.bf16 %v284_v35, %v283_v34  ;;  %v243_v27 = vld [vmem:[#allocation8 + $0x450] sm:$0xff]  ;;  %v276_v31 = vld [vmem:[#allocation8 + $0x558] sm:$0xff]  ;;  %v293_v34 = vld [vmem:[#allocation8 + $0x5e0] sm:$0xff] }
  0xfa   :  { %3765 = vmatpush3.bf16.msra.mxu0 %v3764_v40  ;;  %v3818_v40 = vpack.c.bf16 %v252_v33, %v251_v32  ;;  %v275_v29 = vld [vmem:[#allocation8 + $0x550] sm:$0xff]  ;;  %v261_v32 = vld [vmem:[#allocation8 + $0x4e0] sm:$0xff]  ;;  %v262_v33 = vld [vmem:[#allocation8 + $0x4e8] sm:$0xff] }
  0xfb   :  { %3797 = vmatpush3.bf16.msra.mxu1 %v3796_v41  ;;  %3767 = vmatprep.subr.bf16.mxu0 %v3766_v42  ;;  %v235_v41 = vld [vmem:[#allocation8 + $0x410] sm:$0xff]  ;;  %v236_v42 = vld [vmem:[#allocation8 + $0x418] sm:$0xff]  ;;  %v294_v35 = vld [vmem:[#allocation8 + $0x5e8] sm:$0xff] }
  0xfc   :  { %3799 = vmatprep.subr.bf16.mxu1 %v3798_v46  ;;  %v253_v46 = vld [vmem:[#allocation8 + $0x4a0] sm:$0xff]  ;;  %v3820_v51 = vpack.c.bf16 %v236_v42, %v235_v41  ;;  %v3870_v42 = vpack.c.bf16 %v294_v35, %v293_v34  ;;  %v351_v34 = vld [vmem:[#allocation8 + $0x7b0] sm:$0xff]  ;;  %v352_v35 = vld [vmem:[#allocation8 + $0x7b8] sm:$0xff] }
  0xfd   :  { %v277_v41 = vld [vmem:[#allocation8 + $0x560] sm:$0xff] }
  0xfe   :  { %3769 = vmatpush3.bf16.msra.mxu0 %v3768_v52  ;;  %v84_v52 = vld [vmem:[#allocation3 + $0x58] sm:$0xff] }
  0xff   :  { %3801 = vmatpush3.bf16.msra.mxu1 %v3800_v53  ;;  %3771 = vmatprep.subr.bf16.mxu0 %v3770_v54  ;;  %v3852_v53 = vpack.c.bf16 %v268_v45, %v267_v43  ;;  %v3822_v54 = vpack.c.bf16 %v254_v47, %v253_v46  ;;  %v278_v43 = vld [vmem:[#allocation8 + $0x568] sm:$0xff]  ;;  %v264_v45 = vld [vmem:[#allocation8 + $0x4f8] sm:$0xff]  ;;  %v295_v46 = vld [vmem:[#allocation8 + $0x5f0] sm:$0xff] }
 0x100   :  { %3803 = vmatprep.subr.bf16.mxu1 %v3802_v58  ;;  %v3854_v58 = vpack.c.bf16 %v286_v49, %v285_v48  ;;  %v296_v47 = vld [vmem:[#allocation8 + $0x5f8] sm:$0xff]  ;;  %v3872_v49 = vpack.c.bf16 %v278_v43, %v277_v41  ;;  %v335_v41 = vld [vmem:[#allocation8 + $0x730] sm:$0xff] }
 0x101   :  { %v336_v43 = vld [vmem:[#allocation8 + $0x738] sm:$0xff] }
 0x102   :  { %3773 = vmatpush3.bf16.msra.mxu0 %v3772_v0  ;;  %v3824_v0 = vpack.c.bf16 %v238_v56, %v237_v55  ;;  %v280_v55 = vld [vmem:[#allocation8 + $0x578] sm:$0xff]  ;;  %v313_v56 = vld [vmem:[#allocation8 + $0x680] sm:$0xff] }
 0x103   :  { %3805 = vmatpush3.bf16.msra.mxu1 %v3804_v1  ;;  %3775 = vmatprep.subr.bf16.mxu0 %v3774_v2  ;;  %v3856_v1 = vpack.c.bf16 %v270_v59, %v269_v57  ;;  %v3826_v2 = vpack.c.bf16 %v256_v61, %v255_v60  ;;  %v314_v57 = vld [vmem:[#allocation8 + $0x688] sm:$0xff] }
 0x104   :  { %3807 = vmatprep.subr.bf16.mxu1 %v3806_v6  ;;  %v3858_v6 = vpack.c.bf16 %v288_v63, %v287_v62  ;;  %v346_v59 = vld [vmem:[#allocation8 + $0x788] sm:$0xff]  ;;  %v3878_v62 = vpack.c.bf16 %v314_v57, %v313_v56  ;;  %v297_v63 = vld [vmem:[#allocation8 + $0x600] sm:$0xff]  ;;  %v323_v56 = vld [vmem:[#allocation8 + $0x6d0] sm:$0xff] }
 0x105   :  { %v324_v57 = vld [vmem:[#allocation8 + $0x6d8] sm:$0xff] }
 0x106   :  { %3777 = vmatpush3.bf16.msra.mxu0 %v3776_v12  ;;  %v3828_v12 = vpack.c.bf16 %v240_v4, %v239_v3  ;;  %v330_v3 = vld [vmem:[#allocation8 + $0x708] sm:$0xff]  ;;  %v315_v4 = vld [vmem:[#allocation8 + $0x690] sm:$0xff] }
 0x107   :  { %3809 = vmatpush3.bf16.msra.mxu1 %v3808_v13  ;;  %3779 = vmatprep.subr.bf16.mxu0 %v3778_v14  ;;  %v3860_v13 = vpack.c.bf16 %v272_v7, %v271_v5  ;;  %v3830_v14 = vpack.c.bf16 %v258_v9, %v257_v8  ;;  %v316_v5 = vld [vmem:[#allocation8 + $0x698] sm:$0xff]  ;;  %v81_v8 = vld [vmem:[#allocation3 + $0x40] sm:$0xff] }
 0x108   :  { %3811 = vmatprep.subr.bf16.mxu1 %v3810_v18  ;;  %v3862_v18 = vpack.c.bf16 %v290_v11, %v289_v10  ;;  %v348_v7 = vld [vmem:[#allocation8 + $0x798] sm:$0xff]  ;;  %v83_v10 = vld [vmem:[#allocation3 + $0x50] sm:$0xff] }
 0x10a   :  { %3781 = vmatpush3.bf16.msra.mxu0 %v3780_v24  ;;  %v3832_v24 = vpack.c.bf16 %v242_v16, %v241_v15  ;;  %v331_v15 = vld [vmem:[#allocation8 + $0x710] sm:$0xff] }
 0x10b   :  { %3813 = vmatpush3.bf16.msra.mxu1 %v3812_v25  ;;  %3815 = vmatprep.subr.bf16.mxu0 %v3814_v26  ;;  %v3864_v25 = vpack.c.bf16 %v274_v19, %v273_v17  ;;  %v3834_v26 = vpack.c.bf16 %v260_v21, %v259_v20  ;;  %v332_v17 = vld [vmem:[#allocation8 + $0x718] sm:$0xff]  ;;  %v318_v19 = vld [vmem:[#allocation8 + $0x6a8] sm:$0xff]  ;;  %v349_v20 = vld [vmem:[#allocation8 + $0x7a0] sm:$0xff] }
 0x10c   :  { %3847 = vmatprep.subr.bf16.mxu1 %v3846_v30  ;;  %v3866_v30 = vpack.c.bf16 %v292_v23, %v291_v22  ;;  %v350_v21 = vld [vmem:[#allocation8 + $0x7a8] sm:$0xff] }
 0x10d   :  { %1654 = vmatmul.mubr.f32.vlgmr.msra.gmra.mrb[10].mxu0 %v77_v36  ;;  %v3836_v36 = vpack.c.bf16 %v244_v28, %v243_v27  ;;  %v86_v22 = vld [vmem:[#allocation3 + $0x68] sm:$0xff]  ;;  %v301_v27 = vld [vmem:[#allocation8 + $0x620] sm:$0xff] }
 0x10e   :  { %3817 = vmatpush3.bf16.msra.mxu0 %v3816_v37  ;;  %1724 = vmatmul.mubr.f32.vlgmr.msra.gmra.mrb[10].mxu1 %v79_v38  ;;  %v3868_v37 = vpack.c.bf16 %v276_v31, %v275_v29  ;;  %v3838_v38 = vpack.c.bf16 %v262_v33, %v261_v32  ;;  %v302_v28 = vld [vmem:[#allocation8 + $0x628] sm:$0xff]  ;;  %v333_v29 = vld [vmem:[#allocation8 + $0x720] sm:$0xff]  ;;  %v319_v32 = vld [vmem:[#allocation8 + $0x6b0] sm:$0xff] }
 0x10f   :  { %3849 = vmatpush3.bf16.msra.mxu1 %v3848_v39  ;;  %3819 = vmatprep.subr.bf16.mxu0 %v3818_v40  ;;  %v245_v39 = vld [vmem:[#allocation8 + $0x460] sm:$0xff]  ;;  %v246_v40 = vld [vmem:[#allocation8 + $0x468] sm:$0xff]  ;;  %v320_v33 = vld [vmem:[#allocation8 + $0x6b8] sm:$0xff] }
 0x110   :  { %3851 = vmatprep.subr.bf16.mxu1 %v3850_v44  ;;  %1793 = vmatprep.mubr.f32.mxu0 %v82_v50  ;;  %v263_v44 = vld [vmem:[#allocation8 + $0x4f0] sm:$0xff]  ;;  %v3840_v48 = vpack.c.bf16 %v246_v40, %v245_v39  ;;  %v334_v31 = vld [vmem:[#allocation8 + $0x728] sm:$0xff]  ;;  %v304_v40 = vld [vmem:[#allocation8 + $0x638] sm:$0xff] }
 0x111   :  { %1863 = vmatprep.mubr.f32.mxu1 %v84_v52  ;;  %v3842_v50 = vpack.c.bf16 %v264_v45, %v263_v44  ;;  %v248_v52 = vld [vmem:[#allocation8 + $0x478] sm:$0xff]  ;;  %v303_v39 = vld [vmem:[#allocation8 + $0x630] sm:$0xff]  ;;  %v321_v44 = vld [vmem:[#allocation8 + $0x6c0] sm:$0xff] }
 0x112   :  { %3821 = vmatpush3.bf16.msra.mxu0 %v3820_v51  ;;  %v247_v51 = vld [vmem:[#allocation8 + $0x470] sm:$0xff]  ;;  %v322_v45 = vld [vmem:[#allocation8 + $0x6c8] sm:$0xff] }
 0x113   :  { %3853 = vmatpush3.bf16.msra.mxu1 %v3852_v53  ;;  %3823 = vmatprep.subr.bf16.mxu0 %v3822_v54  ;;  %v279_v53 = vld [vmem:[#allocation8 + $0x570] sm:$0xff]  ;;  %v3874_v54 = vpack.c.bf16 %v296_v47, %v295_v46  ;;  %v3844_v60 = vpack.c.bf16 %v248_v52, %v247_v51  ;;  %v353_v46 = vld [vmem:[#allocation8 + $0x7c0] sm:$0xff]  ;;  %v354_v47 = vld [vmem:[#allocation8 + $0x7c8] sm:$0xff] }
 0x114   :  { %3855 = vmatprep.subr.bf16.mxu1 %v3854_v58  ;;  %v345_v58 = vld [vmem:[#allocation8 + $0x780] sm:$0xff]  ;;  %v3876_v61 = vpack.c.bf16 %v280_v55, %v279_v53  ;;  %v306_v52 = vld [vmem:[#allocation8 + $0x648] sm:$0xff] }
 0x115   :  { %v305_v51 = vld [vmem:[#allocation8 + $0x640] sm:$0xff]  ;;  %v338_v55 = vld [vmem:[#allocation8 + $0x748] sm:$0xff] }
 0x116   :  { %3825 = vmatpush3.bf16.msra.mxu0 %v3824_v0  ;;  %v298_v0 = vld [vmem:[#allocation8 + $0x608] sm:$0xff]  ;;  %v337_v53 = vld [vmem:[#allocation8 + $0x740] sm:$0xff] }
 0x117   :  { %3857 = vmatpush3.bf16.msra.mxu1 %v3856_v1  ;;  %3827 = vmatprep.subr.bf16.mxu0 %v3826_v2  ;;  %v329_v1 = vld [vmem:[#allocation8 + $0x700] sm:$0xff]  ;;  %v3910_v2 = vpack.c.bf16 %v346_v59, %v345_v58  ;;  %v3880_v9 = vpack.c.bf16 %v298_v0, %v297_v63  ;;  %v355_v58 = vld [vmem:[#allocation8 + $0x7d0] sm:$0xff]  ;;  %v356_v59 = vld [vmem:[#allocation8 + $0x7d8] sm:$0xff] }
 0x118   :  { %3859 = vmatprep.subr.bf16.mxu1 %v3858_v6  ;;  %v347_v6 = vld [vmem:[#allocation8 + $0x790] sm:$0xff]  ;;  %v3912_v11 = vpack.c.bf16 %v330_v3, %v329_v1  ;;  %v308_v0 = vld [vmem:[#allocation8 + $0x658] sm:$0xff] }
 0x119   :  { %v3914_v16 = vpack.c.bf16 %v348_v7, %v347_v6  ;;  %v307_v63 = vld [vmem:[#allocation8 + $0x650] sm:$0xff]  ;;  %v340_v3 = vld [vmem:[#allocation8 + $0x758] sm:$0xff]  ;;  %v357_v6 = vld [vmem:[#allocation8 + $0x7e0] sm:$0xff] }
 0x11a   :  { %3829 = vmatpush3.bf16.msra.mxu0 %v3828_v12  ;;  %v3882_v12 = vpack.c.bf16 %v316_v5, %v315_v4  ;;  %v339_v1 = vld [vmem:[#allocation8 + $0x750] sm:$0xff]  ;;  %v325_v4 = vld [vmem:[#allocation8 + $0x6e0] sm:$0xff]  ;;  %v326_v5 = vld [vmem:[#allocation8 + $0x6e8] sm:$0xff] }
 0x11b   :  { %3861 = vmatpush3.bf16.msra.mxu1 %v3860_v13  ;;  %3831 = vmatprep.subr.bf16.mxu0 %v3830_v14  ;;  %v299_v13 = vld [vmem:[#allocation8 + $0x610] sm:$0xff]  ;;  %v300_v14 = vld [vmem:[#allocation8 + $0x618] sm:$0xff]  ;;  %v358_v7 = vld [vmem:[#allocation8 + $0x7e8] sm:$0xff] }
 0x11c   :  { %3863 = vmatprep.subr.bf16.mxu1 %v3862_v18  ;;  %v317_v18 = vld [vmem:[#allocation8 + $0x6a0] sm:$0xff]  ;;  %v3884_v23 = vpack.c.bf16 %v300_v14, %v299_v13 }
 0x11d   :  { %v341_v13 = vld [vmem:[#allocation8 + $0x760] sm:$0xff] }
 0x11e   :  { %3833 = vmatpush3.bf16.msra.mxu0 %v3832_v24  ;;  %v88_v24 = vld [vmem:[#allocation3 + $0x78] sm:$0xff] }
 0x11f   :  { %3865 = vmatpush3.bf16.msra.mxu1 %v3864_v25  ;;  %3835 = vmatprep.subr.bf16.mxu0 %v3834_v26  ;;  %v3916_v25 = vpack.c.bf16 %v332_v17, %v331_v15  ;;  %v3886_v26 = vpack.c.bf16 %v318_v19, %v317_v18  ;;  %v3934_v15 = vpack.c.bf16 %v358_v7, %v357_v6  ;;  %v327_v17 = vld [vmem:[#allocation8 + $0x6f0] sm:$0xff]  ;;  %v328_v18 = vld [vmem:[#allocation8 + $0x6f8] sm:$0xff]  ;;  %v365_v6 = vld [vmem:[#allocation8 + $0x820] sm:$0xff] }
 0x120   :  { %3867 = vmatprep.subr.bf16.mxu1 %v3866_v30  ;;  %v3918_v30 = vpack.c.bf16 %v350_v21, %v349_v20  ;;  %v359_v21 = vld [vmem:[#allocation8 + $0x7f0] sm:$0xff]  ;;  %v366_v7 = vld [vmem:[#allocation8 + $0x828] sm:$0xff] }
 0x122   :  { %3837 = vmatpush3.bf16.msra.mxu0 %v3836_v36  ;;  %v3888_v36 = vpack.c.bf16 %v302_v28, %v301_v27  ;;  %v3906_v28 = vpack.c.bf16 %v328_v18, %v327_v17  ;;  %v367_v18 = vld [vmem:[#allocation8 + $0x830] sm:$0xff] }
 0x123   :  { %3869 = vmatpush3.bf16.msra.mxu1 %v3868_v37  ;;  %3839 = vmatprep.subr.bf16.mxu0 %v3838_v38  ;;  %v3920_v37 = vpack.c.bf16 %v334_v31, %v333_v29  ;;  %v3890_v38 = vpack.c.bf16 %v320_v33, %v319_v32  ;;  %v311_v29 = vld [vmem:[#allocation8 + $0x670] sm:$0xff]  ;;  %v344_v33 = vld [vmem:[#allocation8 + $0x778] sm:$0xff] }
 0x124   :  { %3871 = vmatprep.subr.bf16.mxu1 %v3870_v42  ;;  %v3922_v42 = vpack.c.bf16 %v352_v35, %v351_v34  ;;  %v343_v31 = vld [vmem:[#allocation8 + $0x770] sm:$0xff]  ;;  %v377_v34 = vld [vmem:[#allocation8 + $0x880] sm:$0xff]  ;;  %v378_v35 = vld [vmem:[#allocation8 + $0x888] sm:$0xff] }
 0x126   :  { %3841 = vmatpush3.bf16.msra.mxu0 %v3840_v48  ;;  %v3892_v48 = vpack.c.bf16 %v304_v40, %v303_v39  ;;  %v3940_v40 = vpack.c.bf16 %v344_v33, %v343_v31  ;;  %v370_v31 = vld [vmem:[#allocation8 + $0x848] sm:$0xff] }
 0x127   :  { %3873 = vmatpush3.bf16.msra.mxu1 %v3872_v49  ;;  %3843 = vmatprep.subr.bf16.mxu0 %v3842_v50  ;;  %v3924_v49 = vpack.c.bf16 %v336_v43, %v335_v41  ;;  %v3894_v50 = vpack.c.bf16 %v322_v45, %v321_v44  ;;  %v3942_v41 = vpack.c.bf16 %v378_v35, %v377_v34  ;;  %v362_v43 = vld [vmem:[#allocation8 + $0x808] sm:$0xff]  ;;  %v393_v44 = vld [vmem:[#allocation8 + $0x900] sm:$0xff]  ;;  %v387_v35 = vld [vmem:[#allocation8 + $0x8d0] sm:$0xff] }
 0x128   :  { %3875 = vmatprep.subr.bf16.mxu1 %v3874_v54  ;;  %v3926_v54 = vpack.c.bf16 %v354_v47, %v353_v46  ;;  %v394_v46 = vld [vmem:[#allocation8 + $0x908] sm:$0xff]  ;;  %v379_v47 = vld [vmem:[#allocation8 + $0x890] sm:$0xff] }
 0x129   :  { %v402_v34 = vld [vmem:[#allocation8 + $0x948] sm:$0xff] }
 0x12a   :  { %3845 = vmatpush3.bf16.msra.mxu0 %v3844_v60  ;;  %v3896_v60 = vpack.c.bf16 %v306_v52, %v305_v51  ;;  %v85_v51 = vld [vmem:[#allocation3 + $0x60] sm:$0xff] }
 0x12b   :  { %3877 = vmatpush3.bf16.msra.mxu1 %v3876_v61  ;;  %3879 = vmatprep.subr.bf16.mxu0 %v3878_v62  ;;  %v3928_v61 = vpack.c.bf16 %v338_v55, %v337_v53  ;;  %v3898_v62 = vpack.c.bf16 %v324_v57, %v323_v56  ;;  %v87_v53 = vld [vmem:[#allocation3 + $0x70] sm:$0xff]  ;;  %v364_v57 = vld [vmem:[#allocation8 + $0x818] sm:$0xff] }
 0x12c   :  { %3911 = vmatprep.subr.bf16.mxu1 %v3910_v2  ;;  %v3930_v2 = vpack.c.bf16 %v356_v59, %v355_v58  ;;  %v363_v56 = vld [vmem:[#allocation8 + $0x810] sm:$0xff] }
 0x12d   :  { %1794 = vmatmul.mubr.f32.vlgmr.msra.gmra.mrb[12].mxu0 %v81_v8  ;;  %v3900_v8 = vpack.c.bf16 %v308_v0, %v307_v63  ;;  %v395_v58 = vld [vmem:[#allocation8 + $0x910] sm:$0xff]  ;;  %v413_v63 = vld [vmem:[#allocation8 + $0x9a0] sm:$0xff]  ;;  %v414_v0 = vld [vmem:[#allocation8 + $0x9a8] sm:$0xff] }
 0x12e   :  { %3881 = vmatpush3.bf16.msra.mxu0 %v3880_v9  ;;  %1864 = vmatmul.mubr.f32.vlgmr.msra.gmra.mrb[12].mxu1 %v83_v10  ;;  %v3932_v9 = vpack.c.bf16 %v340_v3, %v339_v1  ;;  %v3902_v10 = vpack.c.bf16 %v326_v5, %v325_v4  ;;  %v90_v1 = vld [vmem:[#allocation3 + $0x88] sm:$0xff]  ;;  %v92_v3 = vld [vmem:[#allocation3 + $0x98] sm:$0xff] }
 0x12f   :  { %3913 = vmatpush3.bf16.msra.mxu1 %v3912_v11  ;;  %3883 = vmatprep.subr.bf16.mxu0 %v3882_v12  ;;  %v309_v11 = vld [vmem:[#allocation8 + $0x660] sm:$0xff]  ;;  %v310_v12 = vld [vmem:[#allocation8 + $0x668] sm:$0xff] }
 0x130   :  { %3915 = vmatprep.subr.bf16.mxu1 %v3914_v16  ;;  %1933 = vmatprep.mubr.f32.mxu0 %v86_v22  ;;  %v342_v16 = vld [vmem:[#allocation8 + $0x768] sm:$0xff]  ;;  %v360_v22 = vld [vmem:[#allocation8 + $0x7f8] sm:$0xff] }
 0x131   :  { %2003 = vmatprep.mubr.f32.mxu1 %v88_v24  ;;  %v3936_v27 = vpack.c.bf16 %v342_v16, %v341_v13  ;;  %v3938_v32 = vpack.c.bf16 %v360_v22, %v359_v21  ;;  %v415_v13 = vld [vmem:[#allocation8 + $0x9b0] sm:$0xff]  ;;  %v400_v22 = vld [vmem:[#allocation8 + $0x938] sm:$0xff] }
 0x132   :  { %3885 = vmatpush3.bf16.msra.mxu0 %v3884_v23 }
 0x133   :  { %3917 = vmatpush3.bf16.msra.mxu1 %v3916_v25  ;;  %3887 = vmatprep.subr.bf16.mxu0 %v3886_v26  ;;  %v3904_v25 = vpack.c.bf16 %v310_v12, %v309_v11  ;;  %v383_v11 = vld [vmem:[#allocation8 + $0x8b0] sm:$0xff]  ;;  %v384_v12 = vld [vmem:[#allocation8 + $0x8b8] sm:$0xff] }
 0x134   :  { %3919 = vmatprep.subr.bf16.mxu1 %v3918_v30  ;;  %v312_v30 = vld [vmem:[#allocation8 + $0x678] sm:$0xff]  ;;  %v3954_v17 = vpack.c.bf16 %v384_v12, %v383_v11  ;;  %v407_v11 = vld [vmem:[#allocation8 + $0x970] sm:$0xff] }
 0x135   :  { %v3908_v39 = vpack.c.bf16 %v312_v30, %v311_v29  ;;  %v369_v30 = vld [vmem:[#allocation8 + $0x840] sm:$0xff] }
 0x136   :  { %3889 = vmatpush3.bf16.msra.mxu0 %v3888_v36 }
 0x137   :  { %3921 = vmatpush3.bf16.msra.mxu1 %v3920_v37  ;;  %3891 = vmatprep.subr.bf16.mxu0 %v3890_v38  ;;  %v409_v37 = vld [vmem:[#allocation8 + $0x980] sm:$0xff]  ;;  %v410_v38 = vld [vmem:[#allocation8 + $0x988] sm:$0xff] }
 0x138   :  { %3923 = vmatprep.subr.bf16.mxu1 %v3922_v42  ;;  %v361_v42 = vld [vmem:[#allocation8 + $0x800] sm:$0xff]  ;;  %v3974_v45 = vpack.c.bf16 %v410_v38, %v409_v37  ;;  %v388_v37 = vld [vmem:[#allocation8 + $0x8d8] sm:$0xff]  ;;  %v419_v38 = vld [vmem:[#allocation8 + $0x9d0] sm:$0xff] }
 0x139   :  { %v3944_v52 = vpack.c.bf16 %v362_v43, %v361_v42  ;;  %v3962_v42 = vpack.c.bf16 %v388_v37, %v387_v35  ;;  %v371_v43 = vld [vmem:[#allocation8 + $0x850] sm:$0xff] }
 0x13a   :  { %3893 = vmatpush3.bf16.msra.mxu0 %v3892_v48  ;;  %v380_v48 = vld [vmem:[#allocation8 + $0x898] sm:$0xff]  ;;  %v427_v37 = vld [vmem:[#allocation8 + $0xa10] sm:$0xff] }
 0x13b   :  { %3925 = vmatpush3.bf16.msra.mxu1 %v3924_v49  ;;  %3895 = vmatprep.subr.bf16.mxu0 %v3894_v50  ;;  %v411_v49 = vld [vmem:[#allocation8 + $0x990] sm:$0xff]  ;;  %v412_v50 = vld [vmem:[#allocation8 + $0x998] sm:$0xff]  ;;  %v3946_v55 = vpack.c.bf16 %v380_v48, %v379_v47  ;;  %v389_v48 = vld [vmem:[#allocation8 + $0x8e0] sm:$0xff] }
 0x13c   :  { %3927 = vmatprep.subr.bf16.mxu1 %v3926_v54  ;;  %v3976_v54 = vpack.c.bf16 %v394_v46, %v393_v44  ;;  %v3978_v59 = vpack.c.bf16 %v412_v50, %v411_v49  ;;  %v372_v44 = vld [vmem:[#allocation8 + $0x858] sm:$0xff]  ;;  %v390_v49 = vld [vmem:[#allocation8 + $0x8e8] sm:$0xff]  ;;  %v421_v50 = vld [vmem:[#allocation8 + $0x9e0] sm:$0xff] }
 0x13d   :  { %v404_v47 = vld [vmem:[#allocation8 + $0x958] sm:$0xff] }
 0x13e   :  { %3897 = vmatpush3.bf16.msra.mxu0 %v3896_v60  ;;  %v396_v60 = vld [vmem:[#allocation8 + $0x918] sm:$0xff] }
 0x13f   :  { %3929 = vmatpush3.bf16.msra.mxu1 %v3928_v61  ;;  %3899 = vmatprep.subr.bf16.mxu0 %v3898_v62  ;;  %v381_v61 = vld [vmem:[#allocation8 + $0x8a0] sm:$0xff]  ;;  %v382_v62 = vld [vmem:[#allocation8 + $0x8a8] sm:$0xff]  ;;  %v3980_v4 = vpack.c.bf16 %v396_v60, %v395_v58 }
 0x140   :  { %v2622_v14 = vpop.f32.mrb[0].mxu0  ;;  %3931 = vmatprep.subr.bf16.mxu1 %v3930_v2  ;;  %v3948_v2 = vpack.c.bf16 %v364_v57, %v363_v56  ;;  %v3950_v5 = vpack.c.bf16 %v382_v62, %v381_v61  ;;  %v374_v56 = vld [vmem:[#allocation8 + $0x868] sm:$0xff]  ;;  %v405_v57 = vld [vmem:[#allocation8 + $0x960] sm:$0xff]  ;;  %v391_v61 = vld [vmem:[#allocation8 + $0x8f0] sm:$0xff] }
 0x141   :  { %v2657_v19 = vpop.f32.mrb[0].mxu1  ;;  %v2623_v20 = vpop.f32.mrb[1].mxu0  ;;  %v406_v60 = vld [vmem:[#allocation8 + $0x968] sm:$0xff]  ;;  %v392_v62 = vld [vmem:[#allocation8 + $0x8f8] sm:$0xff] }
 0x142   :  { %v2624_v23 = vadd.f32 %v2623_v20, %v2622_v14  ;;  %v2658_v24 = vpop.f32.mrb[1].mxu1  ;;  %3901 = vmatpush3.bf16.msra.mxu0 %v3900_v8  ;;  %v397_v8 = vld [vmem:[#allocation8 + $0x920] sm:$0xff]  ;;  %v416_v14 = vld [vmem:[#allocation8 + $0x9b8] sm:$0xff]  ;;  %v399_v20 = vld [vmem:[#allocation8 + $0x930] sm:$0xff] }
 0x143   :  { %v2659_v26 = vadd.f32 %v2658_v24, %v2657_v19  ;;  %3933 = vmatpush3.bf16.msra.mxu1 %v3932_v9  ;;  %3903 = vmatprep.subr.bf16.mxu0 %v3902_v10  ;;  %v3982_v9 = vpack.c.bf16 %v414_v0, %v413_v63  ;;  %v398_v10 = vld [vmem:[#allocation8 + $0x928] sm:$0xff]  ;;  %v368_v19 = vld [vmem:[#allocation8 + $0x838] sm:$0xff]  ;;  %v3986_v21 = vpack.c.bf16 %v416_v14, %v415_v13 }
 0x144   :  { %3935 = vmatprep.subr.bf16.mxu1 %v3934_v15  ;;  %v3952_v15 = vpack.c.bf16 %v366_v7, %v365_v6  ;;  %v3984_v16 = vpack.c.bf16 %v398_v10, %v397_v8  ;;  %v386_v24 = vld [vmem:[#allocation8 + $0x8c8] sm:$0xff]  ;;  %v4000_v7 = vpack.c.bf16 %v406_v60, %v405_v57  ;;  %v3970_v8 = vpack.c.bf16 %v392_v62, %v391_v61  ;;  %v376_v10 = vld [vmem:[#allocation8 + $0x878] sm:$0xff] }
 0x145   :  { %v4408_v36 = vadd.f32 %v2659_v26, %v2624_v23  ;;  %v385_v23 = vld [vmem:[#allocation8 + $0x8c0] sm:$0xff]  ;;  %v418_v26 = vld [vmem:[#allocation8 + $0x9c8] sm:$0xff]  ;;  %v408_v14 = vld [vmem:[#allocation8 + $0x978] sm:$0xff] }
 0x146   :  { %3905 = vmatpush3.bf16.msra.mxu0 %v3904_v25  ;;  %v417_v25 = vld [vmem:[#allocation8 + $0x9c0] sm:$0xff]  ;;  %v3958_v29 = vpack.c.bf16 %v386_v24, %v385_v23  ;;  %v426_v24 = vld [vmem:[#allocation8 + $0xa08] sm:$0xff]  ;;  %v448_v57 = vld [vmem:[#allocation8 + $0xab8] sm:$0xff] }
 0x147   :  { %3937 = vmatpush3.bf16.msra.mxu1 %v3936_v27  ;;  %3907 = vmatprep.subr.bf16.mxu0 %v3906_v28  ;;  %v3956_v27 = vpack.c.bf16 %v368_v19, %v367_v18  ;;  %v3988_v28 = vpack.c.bf16 %v400_v22, %v399_v20  ;;  %v3990_v33 = vpack.c.bf16 %v418_v26, %v417_v25  ;;  %v474_v18 = vld [vmem:[#allocation8 + $0xb88] sm:$0xff]  ;;  %v425_v23 = vld [vmem:[#allocation8 + $0xa00] sm:$0xff] }
 0x148   :  { %3939 = vmatprep.subr.bf16.mxu1 %v3938_v32  ;;  %v401_v32 = vld [vmem:[#allocation8 + $0x940] sm:$0xff]  ;;  %v458_v26 = vld [vmem:[#allocation8 + $0xb08] sm:$0xff] }
 0x149   :  { %v457_v25 = vld [vmem:[#allocation8 + $0xb00] sm:$0xff] }
 0x14a   :  { %3909 = vmatpush3.bf16.msra.mxu0 %v3908_v39  ;;  %v420_v39 = vld [vmem:[#allocation8 + $0x9d8] sm:$0xff] }
 0x14b   :  { %3941 = vmatpush3.bf16.msra.mxu1 %v3940_v40  ;;  %3943 = vmatprep.subr.bf16.mxu0 %v3942_v41  ;;  %v3960_v40 = vpack.c.bf16 %v370_v31, %v369_v30  ;;  %v3992_v41 = vpack.c.bf16 %v402_v34, %v401_v32  ;;  %v3994_v46 = vpack.c.bf16 %v420_v39, %v419_v38  ;;  %v476_v30 = vld [vmem:[#allocation8 + $0xb98] sm:$0xff]  ;;  %v89_v31 = vld [vmem:[#allocation3 + $0x80] sm:$0xff]  ;;  %v459_v39 = vld [vmem:[#allocation8 + $0xb10] sm:$0xff] }
 0x14c   :  { %3975 = vmatprep.subr.bf16.mxu1 %v3974_v45  ;;  %v403_v45 = vld [vmem:[#allocation8 + $0x950] sm:$0xff]  ;;  %v4008_v32 = vpack.c.bf16 %v426_v24, %v425_v23  ;;  %v4040_v34 = vpack.c.bf16 %v458_v26, %v457_v25  ;;  %v428_v38 = vld [vmem:[#allocation8 + $0xa18] sm:$0xff] }
 0x14d   :  { %1934 = vmatmul.mubr.f32.vlgmr.msra.gmra.mrb[14].mxu0 %v85_v51  ;;  %v422_v51 = vld [vmem:[#allocation8 + $0x9e8] sm:$0xff]  ;;  %v435_v24 = vld [vmem:[#allocation8 + $0xa50] sm:$0xff]  ;;  %v436_v25 = vld [vmem:[#allocation8 + $0xa58] sm:$0xff] }
 0x14e   :  { %3945 = vmatpush3.bf16.msra.mxu0 %v3944_v52  ;;  %2004 = vmatmul.mubr.f32.vlgmr.msra.gmra.mrb[14].mxu1 %v87_v53  ;;  %v3964_v52 = vpack.c.bf16 %v372_v44, %v371_v43  ;;  %v3996_v53 = vpack.c.bf16 %v404_v47, %v403_v45  ;;  %v446_v43 = vld [vmem:[#allocation8 + $0xaa8] sm:$0xff]  ;;  %v477_v44 = vld [vmem:[#allocation8 + $0xba0] sm:$0xff]  ;;  %v4012_v47 = vpack.c.bf16 %v428_v38, %v427_v37 }
 0x14f   :  { %3977 = vmatpush3.bf16.msra.mxu1 %v3976_v54  ;;  %3947 = vmatprep.subr.bf16.mxu0 %v3946_v55  ;;  %v3966_v54 = vpack.c.bf16 %v390_v49, %v389_v48  ;;  %v373_v55 = vld [vmem:[#allocation8 + $0x860] sm:$0xff]  ;;  %v478_v45 = vld [vmem:[#allocation8 + $0xba8] sm:$0xff]  ;;  %v96_v48 = vld [vmem:[#allocation3 + $0xb8] sm:$0xff] }
 0x150   :  { %3979 = vmatprep.subr.bf16.mxu1 %v3978_v59  ;;  %2073 = vmatprep.mubr.f32.mxu0 %v90_v1  ;;  %v3998_v59 = vpack.c.bf16 %v422_v51, %v421_v50  ;;  %v423_v1 = vld [vmem:[#allocation8 + $0x9f0] sm:$0xff]  ;;  %v429_v51 = vld [vmem:[#allocation8 + $0xa20] sm:$0xff]  ;;  %v438_v37 = vld [vmem:[#allocation8 + $0xa68] sm:$0xff] }
 0x151   :  { %2143 = vmatprep.mubr.f32.mxu1 %v92_v3  ;;  %v469_v38 = vld [vmem:[#allocation8 + $0xb60] sm:$0xff] }
 0x152   :  { %3949 = vmatpush3.bf16.msra.mxu0 %v3948_v2  ;;  %v424_v2 = vld [vmem:[#allocation8 + $0x9f8] sm:$0xff] }
 0x153   :  { %3981 = vmatpush3.bf16.msra.mxu1 %v3980_v4  ;;  %3951 = vmatprep.subr.bf16.mxu0 %v3950_v5  ;;  %v3968_v5 = vpack.c.bf16 %v374_v56, %v373_v55  ;;  %v4002_v13 = vpack.c.bf16 %v424_v2, %v423_v1  ;;  %v462_v55 = vld [vmem:[#allocation8 + $0xb28] sm:$0xff]  ;;  %v447_v56 = vld [vmem:[#allocation8 + $0xab0] sm:$0xff] }
 0x154   :  { %3983 = vmatprep.subr.bf16.mxu1 %v3982_v9  ;;  %v375_v9 = vld [vmem:[#allocation8 + $0x870] sm:$0xff]  ;;  %v4018_v62 = vpack.c.bf16 %v448_v57, %v447_v56 }
 0x155   :  { %v3972_v20 = vpack.c.bf16 %v376_v10, %v375_v9  ;;  %v463_v1 = vld [vmem:[#allocation8 + $0xb30] sm:$0xff] }
 0x156   :  { %3953 = vmatpush3.bf16.msra.mxu0 %v3952_v15  ;;  %v441_v15 = vld [vmem:[#allocation8 + $0xa80] sm:$0xff]  ;;  %v471_v56 = vld [vmem:[#allocation8 + $0xb70] sm:$0xff] }
 0x157   :  { %3985 = vmatpush3.bf16.msra.mxu1 %v3984_v16  ;;  %3955 = vmatprep.subr.bf16.mxu0 %v3954_v17  ;;  %v442_v16 = vld [vmem:[#allocation8 + $0xa88] sm:$0xff]  ;;  %v473_v17 = vld [vmem:[#allocation8 + $0xb80] sm:$0xff] }
 0x158   :  { %3987 = vmatprep.subr.bf16.mxu1 %v3986_v21  ;;  %v4004_v21 = vpack.c.bf16 %v408_v14, %v407_v11  ;;  %v4006_v22 = vpack.c.bf16 %v442_v16, %v441_v15  ;;  %v433_v11 = vld [vmem:[#allocation8 + $0xa40] sm:$0xff]  ;;  %v466_v15 = vld [vmem:[#allocation8 + $0xb48] sm:$0xff]  ;;  %v451_v16 = vld [vmem:[#allocation8 + $0xad0] sm:$0xff] }
 0x15a   :  { %3957 = vmatpush3.bf16.msra.mxu0 %v3956_v27  ;;  %v443_v27 = vld [vmem:[#allocation8 + $0xa90] sm:$0xff] }
 0x15b   :  { %3989 = vmatpush3.bf16.msra.mxu1 %v3988_v28  ;;  %3959 = vmatprep.subr.bf16.mxu0 %v3958_v29  ;;  %v444_v28 = vld [vmem:[#allocation8 + $0xa98] sm:$0xff]  ;;  %v475_v29 = vld [vmem:[#allocation8 + $0xb90] sm:$0xff] }
 0x15c   :  { %3991 = vmatprep.subr.bf16.mxu1 %v3990_v33  ;;  %v91_v33 = vld [vmem:[#allocation3 + $0x90] sm:$0xff]  ;;  %v4010_v35 = vpack.c.bf16 %v444_v28, %v443_v27  ;;  %v468_v27 = vld [vmem:[#allocation8 + $0xb58] sm:$0xff]  ;;  %v453_v28 = vld [vmem:[#allocation8 + $0xae0] sm:$0xff] }
 0x15e   :  { %3961 = vmatpush3.bf16.msra.mxu0 %v3960_v40  ;;  %v4042_v40 = vpack.c.bf16 %v476_v30, %v475_v29  ;;  %v454_v29 = vld [vmem:[#allocation8 + $0xae8] sm:$0xff]  ;;  %v485_v30 = vld [vmem:[#allocation8 + $0xbe0] sm:$0xff] }
 0x15f   :  { %3993 = vmatpush3.bf16.msra.mxu1 %v3992_v41  ;;  %3963 = vmatprep.subr.bf16.mxu0 %v3962_v42  ;;  %v460_v41 = vld [vmem:[#allocation8 + $0xb18] sm:$0xff]  ;;  %v445_v42 = vld [vmem:[#allocation8 + $0xaa0] sm:$0xff] }
 0x160   :  { %v2692_v58 = vpop.f32.mrb[2].mxu0  ;;  %3995 = vmatprep.subr.bf16.mxu1 %v3994_v46  ;;  %v94_v46 = vld [vmem:[#allocation3 + $0xa8] sm:$0xff]  ;;  %v4044_v49 = vpack.c.bf16 %v460_v41, %v459_v39  ;;  %v4014_v50 = vpack.c.bf16 %v446_v43, %v445_v42  ;;  %v455_v42 = vld [vmem:[#allocation8 + $0xaf0] sm:$0xff]  ;;  %v456_v43 = vld [vmem:[#allocation8 + $0xaf8] sm:$0xff] }
 0x161   :  { %v2693_v63 = vpop.f32.mrb[3].mxu0  ;;  %v2727_v0 = vpop.f32.mrb[2].mxu1  ;;  %v470_v41 = vld [vmem:[#allocation8 + $0xb68] sm:$0xff] }
 0x162   :  { %v2694_v3 = vadd.f32 %v2693_v63, %v2692_v58  ;;  %3965 = vmatpush3.bf16.msra.mxu0 %v3964_v52  ;;  %v2728_v4 = vpop.f32.mrb[3].mxu1  ;;  %v430_v52 = vld [vmem:[#allocation8 + $0xa28] sm:$0xff]  ;;  %v479_v58 = vld [vmem:[#allocation8 + $0xbb0] sm:$0xff] }
 0x163   :  { %v2729_v6 = vadd.f32 %v2728_v4, %v2727_v0  ;;  %3997 = vmatpush3.bf16.msra.mxu1 %v3996_v53  ;;  %3967 = vmatprep.subr.bf16.mxu0 %v3966_v54  ;;  %v461_v53 = vld [vmem:[#allocation8 + $0xb20] sm:$0xff]  ;;  %v4046_v54 = vpack.c.bf16 %v478_v45, %v477_v44  ;;  %v4016_v60 = vpack.c.bf16 %v430_v52, %v429_v51  ;;  %v431_v63 = vld [vmem:[#allocation8 + $0xa30] sm:$0xff]  ;;  %v432_v0 = vld [vmem:[#allocation8 + $0xa38] sm:$0xff] }
 0x164   :  { %v1096_v12 = vadd.f32 %v2694_v3, %v4408_v36  ;;  %3999 = vmatprep.subr.bf16.mxu1 %v3998_v59  ;;  %v4038_v36 = vpack.c.bf16 %v474_v18, %v473_v17  ;;  %v480_v59 = vld [vmem:[#allocation8 + $0xbb8] sm:$0xff]  ;;  %v4048_v61 = vpack.c.bf16 %v462_v55, %v461_v53  ;;  %v449_v4 = vld [vmem:[#allocation8 + $0xac0] sm:$0xff]  ;;  %v483_v18 = vld [vmem:[#allocation8 + $0xbd0] sm:$0xff]  ;;  %v4064_v52 = vpack.c.bf16 %v470_v41, %v469_v38 }
 0x165   :  { %v4050_v2 = vpack.c.bf16 %v480_v59, %v479_v58  ;;  %v464_v3 = vld [vmem:[#allocation8 + $0xb38] sm:$0xff]  ;;  %v4034_v53 = vpack.c.bf16 %v456_v43, %v455_v42 }
 0x166   :  { %v4411_v19 = vadd.f32 %v2729_v6, %v1096_v12  ;;  %3969 = vmatpush3.bf16.msra.mxu0 %v3968_v5  ;;  %v450_v5 = vld [vmem:[#allocation8 + $0xac8] sm:$0xff]  ;;  %v481_v6 = vld [vmem:[#allocation8 + $0xbc0] sm:$0xff]  ;;  %v4052_v9 = vpack.c.bf16 %v464_v3, %v463_v1  ;;  %v452_v17 = vld [vmem:[#allocation8 + $0xad8] sm:$0xff] }
 0x167   :  { %4001 = vmatpush3.bf16.msra.mxu1 %v4000_v7  ;;  %3971 = vmatprep.subr.bf16.mxu0 %v3970_v8  ;;  %v482_v7 = vld [vmem:[#allocation8 + $0xbc8] sm:$0xff]  ;;  %v4020_v8 = vpack.c.bf16 %v432_v0, %v431_v63  ;;  %v4022_v10 = vpack.c.bf16 %v450_v5, %v449_v4  ;;  %v4026_v23 = vpack.c.bf16 %v452_v17, %v451_v16  ;;  %v440_v55 = vld [vmem:[#allocation8 + $0xa78] sm:$0xff]  ;;  %v489_v4 = vld [vmem:[#allocation8 + $0xc00] sm:$0xff] }
 0x168   :  { %4003 = vmatprep.subr.bf16.mxu1 %v4002_v13  ;;  %v434_v12 = vld [vmem:[#allocation8 + $0xa48] sm:$0xff]  ;;  %v465_v13 = vld [vmem:[#allocation8 + $0xb40] sm:$0xff]  ;;  %v4054_v14 = vpack.c.bf16 %v482_v7, %v481_v6  ;;  %v472_v59 = vld [vmem:[#allocation8 + $0xb78] sm:$0xff] }
 0x169   :  { %v538_v63 = vld [vmem:[#allocation8 + $0xd88] sm:$0xff]  ;;  %v521_v6 = vld [vmem:[#allocation8 + $0xd00] sm:$0xff]  ;;  %v491_v17 = vld [vmem:[#allocation8 + $0xc10] sm:$0xff] }
 0x16a   :  { %3973 = vmatpush3.bf16.msra.mxu0 %v3972_v20  ;;  %v484_v20 = vld [vmem:[#allocation8 + $0xbd8] sm:$0xff]  ;;  %v490_v5 = vld [vmem:[#allocation8 + $0xc08] sm:$0xff] }
 0x16b   :  { %4005 = vmatpush3.bf16.msra.mxu1 %v4004_v21  ;;  %4007 = vmatprep.subr.bf16.mxu0 %v4006_v22  ;;  %v4024_v21 = vpack.c.bf16 %v434_v12, %v433_v11  ;;  %v4056_v22 = vpack.c.bf16 %v466_v15, %v465_v13  ;;  %v4058_v26 = vpack.c.bf16 %v484_v20, %v483_v18  ;;  %v522_v7 = vld [vmem:[#allocation8 + $0xd08] sm:$0xff]  ;;  %v540_v11 = vld [vmem:[#allocation8 + $0xd98] sm:$0xff]  ;;  %v93_v12 = vld [vmem:[#allocation3 + $0xa0] sm:$0xff] }
 0x16c   :  { %4039 = vmatprep.subr.bf16.mxu1 %v4038_v36  ;;  %v467_v36 = vld [vmem:[#allocation8 + $0xb50] sm:$0xff]  ;;  %v4072_v13 = vpack.c.bf16 %v490_v5, %v489_v4  ;;  %v4104_v15 = vpack.c.bf16 %v522_v7, %v521_v6  ;;  %v492_v18 = vld [vmem:[#allocation8 + $0xc18] sm:$0xff] }
 0x16d   :  { %2074 = vmatmul.mubr.f32.vlgmr.msra.gmra.mrb[16].mxu0 %v89_v31  ;;  %v486_v31 = vld [vmem:[#allocation8 + $0xbe8] sm:$0xff]  ;;  %v523_v20 = vld [vmem:[#allocation8 + $0xd10] sm:$0xff]  ;;  %v512_v38 = vld [vmem:[#allocation8 + $0xcb8] sm:$0xff] }
 0x16e   :  { %4009 = vmatpush3.bf16.msra.mxu0 %v4008_v32  ;;  %2144 = vmatmul.mubr.f32.vlgmr.msra.gmra.mrb[16].mxu1 %v91_v33  ;;  %v4028_v32 = vpack.c.bf16 %v436_v25, %v435_v24  ;;  %v4060_v33 = vpack.c.bf16 %v468_v27, %v467_v36  ;;  %v510_v24 = vld [vmem:[#allocation8 + $0xca8] sm:$0xff]  ;;  %v541_v25 = vld [vmem:[#allocation8 + $0xda0] sm:$0xff]  ;;  %v4076_v27 = vpack.c.bf16 %v492_v18, %v491_v17  ;;  %v499_v5 = vld [vmem:[#allocation8 + $0xc50] sm:$0xff] }
 0x16f   :  { %4041 = vmatpush3.bf16.msra.mxu1 %v4040_v34  ;;  %4011 = vmatprep.subr.bf16.mxu0 %v4010_v35  ;;  %v4030_v34 = vpack.c.bf16 %v454_v29, %v453_v28  ;;  %v437_v35 = vld [vmem:[#allocation8 + $0xa60] sm:$0xff]  ;;  %v542_v36 = vld [vmem:[#allocation8 + $0xda8] sm:$0xff]  ;;  %v100_v28 = vld [vmem:[#allocation3 + $0xd8] sm:$0xff] }
 0x170   :  { %4043 = vmatprep.subr.bf16.mxu1 %v4042_v40  ;;  %2213 = vmatprep.mubr.f32.mxu0 %v94_v46  ;;  %v4062_v40 = vpack.c.bf16 %v486_v31, %v485_v30  ;;  %v487_v46 = vld [vmem:[#allocation8 + $0xbf0] sm:$0xff]  ;;  %v493_v31 = vld [vmem:[#allocation8 + $0xc20] sm:$0xff]  ;;  %v500_v6 = vld [vmem:[#allocation8 + $0xc58] sm:$0xff] }
 0x171   :  { %2283 = vmatprep.mubr.f32.mxu1 %v96_v48  ;;  %v502_v17 = vld [vmem:[#allocation8 + $0xc68] sm:$0xff]  ;;  %v533_v18 = vld [vmem:[#allocation8 + $0xd60] sm:$0xff] }
 0x172   :  { %4013 = vmatpush3.bf16.msra.mxu0 %v4012_v47  ;;  %v488_v47 = vld [vmem:[#allocation8 + $0xbf8] sm:$0xff] }
 0x173   :  { %4045 = vmatpush3.bf16.msra.mxu1 %v4044_v49  ;;  %4015 = vmatprep.subr.bf16.mxu0 %v4014_v50  ;;  %v4032_v50 = vpack.c.bf16 %v438_v37, %v437_v35  ;;  %v4066_v58 = vpack.c.bf16 %v488_v47, %v487_v46  ;;  %v526_v35 = vld [vmem:[#allocation8 + $0xd28] sm:$0xff]  ;;  %v511_v37 = vld [vmem:[#allocation8 + $0xcb0] sm:$0xff] }
 0x174   :  { %4047 = vmatprep.subr.bf16.mxu1 %v4046_v54  ;;  %v439_v54 = vld [vmem:[#allocation8 + $0xa70] sm:$0xff]  ;;  %v4082_v43 = vpack.c.bf16 %v512_v38, %v511_v37 }
 0x175   :  { %v4036_v1 = vpack.c.bf16 %v440_v55, %v439_v54  ;;  %v527_v46 = vld [vmem:[#allocation8 + $0xd30] sm:$0xff] }
 0x176   :  { %4017 = vmatpush3.bf16.msra.mxu0 %v4016_v60  ;;  %v505_v60 = vld [vmem:[#allocation8 + $0xc80] sm:$0xff]  ;;  %v535_v37 = vld [vmem:[#allocation8 + $0xd70] sm:$0xff] }
 0x177   :  { %4049 = vmatpush3.bf16.msra.mxu1 %v4048_v61  ;;  %4019 = vmatprep.subr.bf16.mxu0 %v4018_v62  ;;  %v506_v61 = vld [vmem:[#allocation8 + $0xc88] sm:$0xff]  ;;  %v537_v62 = vld [vmem:[#allocation8 + $0xd80] sm:$0xff] }
 0x178   :  { %4051 = vmatprep.subr.bf16.mxu1 %v4050_v2  ;;  %v4068_v2 = vpack.c.bf16 %v472_v59, %v471_v56  ;;  %v4070_v3 = vpack.c.bf16 %v506_v61, %v505_v60  ;;  %v497_v56 = vld [vmem:[#allocation8 + $0xc40] sm:$0xff]  ;;  %v530_v60 = vld [vmem:[#allocation8 + $0xd48] sm:$0xff]  ;;  %v515_v61 = vld [vmem:[#allocation8 + $0xcd0] sm:$0xff] }
 0x17a   :  { %4021 = vmatpush3.bf16.msra.mxu0 %v4020_v8  ;;  %v507_v8 = vld [vmem:[#allocation8 + $0xc90] sm:$0xff] }
 0x17b   :  { %4053 = vmatpush3.bf16.msra.mxu1 %v4052_v9  ;;  %4023 = vmatprep.subr.bf16.mxu0 %v4022_v10  ;;  %v508_v9 = vld [vmem:[#allocation8 + $0xc98] sm:$0xff]  ;;  %v539_v10 = vld [vmem:[#allocation8 + $0xd90] sm:$0xff] }
 0x17c   :  { %4055 = vmatprep.subr.bf16.mxu1 %v4054_v14  ;;  %v95_v14 = vld [vmem:[#allocation3 + $0xb0] sm:$0xff]  ;;  %v4074_v16 = vpack.c.bf16 %v508_v9, %v507_v8  ;;  %v532_v8 = vld [vmem:[#allocation8 + $0xd58] sm:$0xff]  ;;  %v517_v9 = vld [vmem:[#allocation8 + $0xce0] sm:$0xff] }
 0x17e   :  { %4025 = vmatpush3.bf16.msra.mxu0 %v4024_v21  ;;  %v4106_v21 = vpack.c.bf16 %v540_v11, %v539_v10  ;;  %v518_v10 = vld [vmem:[#allocation8 + $0xce8] sm:$0xff]  ;;  %v549_v11 = vld [vmem:[#allocation8 + $0xde0] sm:$0xff] }
 0x17f   :  { %4057 = vmatpush3.bf16.msra.mxu1 %v4056_v22  ;;  %4027 = vmatprep.subr.bf16.mxu0 %v4026_v23  ;;  %v524_v22 = vld [vmem:[#allocation8 + $0xd18] sm:$0xff]  ;;  %v509_v23 = vld [vmem:[#allocation8 + $0xca0] sm:$0xff] }
 0x180   :  { %v2762_v39 = vpop.f32.mrb[4].mxu0  ;;  %4059 = vmatprep.subr.bf16.mxu1 %v4058_v26  ;;  %v98_v26 = vld [vmem:[#allocation3 + $0xc8] sm:$0xff]  ;;  %v4108_v29 = vpack.c.bf16 %v524_v22, %v523_v20  ;;  %v4078_v30 = vpack.c.bf16 %v510_v24, %v509_v23  ;;  %v519_v23 = vld [vmem:[#allocation8 + $0xcf0] sm:$0xff]  ;;  %v520_v24 = vld [vmem:[#allocation8 + $0xcf8] sm:$0xff] }
 0x181   :  { %v2763_v44 = vpop.f32.mrb[5].mxu0  ;;  %v2797_v45 = vpop.f32.mrb[4].mxu1  ;;  %v534_v22 = vld [vmem:[#allocation8 + $0xd68] sm:$0xff] }
 0x182   :  { %v2764_v48 = vadd.f32 %v2763_v44, %v2762_v39  ;;  %4029 = vmatpush3.bf16.msra.mxu0 %v4028_v32  ;;  %v2798_v49 = vpop.f32.mrb[5].mxu1  ;;  %v494_v32 = vld [vmem:[#allocation8 + $0xc28] sm:$0xff]  ;;  %v543_v39 = vld [vmem:[#allocation8 + $0xdb0] sm:$0xff] }
 0x183   :  { %v2799_v51 = vadd.f32 %v2798_v49, %v2797_v45  ;;  %4061 = vmatpush3.bf16.msra.mxu1 %v4060_v33  ;;  %4031 = vmatprep.subr.bf16.mxu0 %v4030_v34  ;;  %v525_v33 = vld [vmem:[#allocation8 + $0xd20] sm:$0xff]  ;;  %v4110_v34 = vpack.c.bf16 %v542_v36, %v541_v25  ;;  %v4080_v41 = vpack.c.bf16 %v494_v32, %v493_v31  ;;  %v495_v44 = vld [vmem:[#allocation8 + $0xc30] sm:$0xff]  ;;  %v496_v45 = vld [vmem:[#allocation8 + $0xc38] sm:$0xff] }
 0x184   :  { %v1236_v57 = vadd.f32 %v2764_v48, %v4411_v19  ;;  %4063 = vmatprep.subr.bf16.mxu1 %v4062_v40  ;;  %v4102_v19 = vpack.c.bf16 %v538_v63, %v537_v62  ;;  %v544_v40 = vld [vmem:[#allocation8 + $0xdb8] sm:$0xff]  ;;  %v4112_v42 = vpack.c.bf16 %v526_v35, %v525_v33  ;;  %v513_v49 = vld [vmem:[#allocation8 + $0xcc0] sm:$0xff]  ;;  %v547_v63 = vld [vmem:[#allocation8 + $0xdd0] sm:$0xff]  ;;  %v4128_v32 = vpack.c.bf16 %v534_v22, %v533_v18 }
 0x185   :  { %v4114_v47 = vpack.c.bf16 %v544_v40, %v543_v39  ;;  %v528_v48 = vld [vmem:[#allocation8 + $0xd38] sm:$0xff]  ;;  %v4098_v33 = vpack.c.bf16 %v520_v24, %v519_v23 }
 0x186   :  { %v4414_v0 = vadd.f32 %v2799_v51, %v1236_v57  ;;  %4033 = vmatpush3.bf16.msra.mxu0 %v4032_v50  ;;  %v514_v50 = vld [vmem:[#allocation8 + $0xcc8] sm:$0xff]  ;;  %v545_v51 = vld [vmem:[#allocation8 + $0xdc0] sm:$0xff]  ;;  %v4116_v54 = vpack.c.bf16 %v528_v48, %v527_v46  ;;  %v516_v62 = vld [vmem:[#allocation8 + $0xcd8] sm:$0xff] }
 0x187   :  { %4065 = vmatpush3.bf16.msra.mxu1 %v4064_v52  ;;  %4035 = vmatprep.subr.bf16.mxu0 %v4034_v53  ;;  %v546_v52 = vld [vmem:[#allocation8 + $0xdc8] sm:$0xff]  ;;  %v4084_v53 = vpack.c.bf16 %v496_v45, %v495_v44  ;;  %v4086_v55 = vpack.c.bf16 %v514_v50, %v513_v49  ;;  %v4090_v4 = vpack.c.bf16 %v516_v62, %v515_v61  ;;  %v504_v35 = vld [vmem:[#allocation8 + $0xc78] sm:$0xff]  ;;  %v553_v49 = vld [vmem:[#allocation8 + $0xe00] sm:$0xff] }
 0x188   :  { %4067 = vmatprep.subr.bf16.mxu1 %v4066_v58  ;;  %v498_v57 = vld [vmem:[#allocation8 + $0xc48] sm:$0xff]  ;;  %v529_v58 = vld [vmem:[#allocation8 + $0xd40] sm:$0xff]  ;;  %v4118_v59 = vpack.c.bf16 %v546_v52, %v545_v51  ;;  %v536_v40 = vld [vmem:[#allocation8 + $0xd78] sm:$0xff] }
 0x189   :  { %v602_v44 = vld [vmem:[#allocation8 + $0xf88] sm:$0xff]  ;;  %v585_v51 = vld [vmem:[#allocation8 + $0xf00] sm:$0xff]  ;;  %v555_v62 = vld [vmem:[#allocation8 + $0xe10] sm:$0xff] }
 0x18a   :  { %4037 = vmatpush3.bf16.msra.mxu0 %v4036_v1  ;;  %v548_v1 = vld [vmem:[#allocation8 + $0xdd8] sm:$0xff]  ;;  %v554_v50 = vld [vmem:[#allocation8 + $0xe08] sm:$0xff] }
 0x18b   :  { %4069 = vmatpush3.bf16.msra.mxu1 %v4068_v2  ;;  %4071 = vmatprep.subr.bf16.mxu0 %v4070_v3  ;;  %v4088_v2 = vpack.c.bf16 %v498_v57, %v497_v56  ;;  %v4120_v3 = vpack.c.bf16 %v530_v60, %v529_v58  ;;  %v4122_v7 = vpack.c.bf16 %v548_v1, %v547_v63  ;;  %v586_v52 = vld [vmem:[#allocation8 + $0xf08] sm:$0xff]  ;;  %v604_v56 = vld [vmem:[#allocation8 + $0xf98] sm:$0xff]  ;;  %v97_v57 = vld [vmem:[#allocation3 + $0xc0] sm:$0xff] }
 0x18c   :  { %4103 = vmatprep.subr.bf16.mxu1 %v4102_v19  ;;  %v531_v19 = vld [vmem:[#allocation8 + $0xd50] sm:$0xff]  ;;  %v4136_v58 = vpack.c.bf16 %v554_v50, %v553_v49  ;;  %v4168_v60 = vpack.c.bf16 %v586_v52, %v585_v51  ;;  %v556_v63 = vld [vmem:[#allocation8 + $0xe18] sm:$0xff] }
 0x18d   :  { %2214 = vmatmul.mubr.f32.vlgmr.msra.gmra.mrb[18].mxu0 %v93_v12  ;;  %v550_v12 = vld [vmem:[#allocation8 + $0xde8] sm:$0xff]  ;;  %v587_v1 = vld [vmem:[#allocation8 + $0xf10] sm:$0xff]  ;;  %v576_v18 = vld [vmem:[#allocation8 + $0xeb8] sm:$0xff] }
 0x18e   :  { %4073 = vmatpush3.bf16.msra.mxu0 %v4072_v13  ;;  %2284 = vmatmul.mubr.f32.vlgmr.msra.gmra.mrb[18].mxu1 %v95_v14  ;;  %v4092_v13 = vpack.c.bf16 %v500_v6, %v499_v5  ;;  %v4124_v14 = vpack.c.bf16 %v532_v8, %v531_v19  ;;  %v574_v5 = vld [vmem:[#allocation8 + $0xea8] sm:$0xff]  ;;  %v605_v6 = vld [vmem:[#allocation8 + $0xfa0] sm:$0xff]  ;;  %v4140_v8 = vpack.c.bf16 %v556_v63, %v555_v62  ;;  %v563_v50 = vld [vmem:[#allocation8 + $0xe50] sm:$0xff] }
 0x18f   :  { %4105 = vmatpush3.bf16.msra.mxu1 %v4104_v15  ;;  %4075 = vmatprep.subr.bf16.mxu0 %v4074_v16  ;;  %v4094_v15 = vpack.c.bf16 %v518_v10, %v517_v9  ;;  %v501_v16 = vld [vmem:[#allocation8 + $0xc60] sm:$0xff]  ;;  %v606_v19 = vld [vmem:[#allocation8 + $0xfa8] sm:$0xff]  ;;  %v104_v9 = vld [vmem:[#allocation3 + $0xf8] sm:$0xff] }
 0x190   :  { %4107 = vmatprep.subr.bf16.mxu1 %v4106_v21  ;;  %2353 = vmatprep.mubr.f32.mxu0 %v98_v26  ;;  %v4126_v21 = vpack.c.bf16 %v550_v12, %v549_v11  ;;  %v551_v26 = vld [vmem:[#allocation8 + $0xdf0] sm:$0xff]  ;;  %v557_v12 = vld [vmem:[#allocation8 + $0xe20] sm:$0xff]  ;;  %v564_v51 = vld [vmem:[#allocation8 + $0xe58] sm:$0xff] }
 0x191   :  { %2423 = vmatprep.mubr.f32.mxu1 %v100_v28  ;;  %v566_v62 = vld [vmem:[#allocation8 + $0xe68] sm:$0xff]  ;;  %v597_v63 = vld [vmem:[#allocation8 + $0xf60] sm:$0xff] }
 0x192   :  { %4077 = vmatpush3.bf16.msra.mxu0 %v4076_v27  ;;  %v552_v27 = vld [vmem:[#allocation8 + $0xdf8] sm:$0xff] }
 0x193   :  { %4109 = vmatpush3.bf16.msra.mxu1 %v4108_v29  ;;  %4079 = vmatprep.subr.bf16.mxu0 %v4078_v30  ;;  %v4096_v30 = vpack.c.bf16 %v502_v17, %v501_v16  ;;  %v4130_v39 = vpack.c.bf16 %v552_v27, %v551_v26  ;;  %v590_v16 = vld [vmem:[#allocation8 + $0xf28] sm:$0xff]  ;;  %v575_v17 = vld [vmem:[#allocation8 + $0xeb0] sm:$0xff] }
 0x194   :  { %4111 = vmatprep.subr.bf16.mxu1 %v4110_v34  ;;  %v503_v34 = vld [vmem:[#allocation8 + $0xc70] sm:$0xff]  ;;  %v4146_v24 = vpack.c.bf16 %v576_v18, %v575_v17 }
 0x195   :  { %v4100_v46 = vpack.c.bf16 %v504_v35, %v503_v34  ;;  %v591_v26 = vld [vmem:[#allocation8 + $0xf30] sm:$0xff] }
 0x196   :  { %4081 = vmatpush3.bf16.msra.mxu0 %v4080_v41  ;;  %v569_v41 = vld [vmem:[#allocation8 + $0xe80] sm:$0xff] }
 0x197   :  { %4113 = vmatpush3.bf16.msra.mxu1 %v4112_v42  ;;  %4083 = vmatprep.subr.bf16.mxu0 %v4082_v43  ;;  %v570_v42 = vld [vmem:[#allocation8 + $0xe88] sm:$0xff]  ;;  %v601_v43 = vld [vmem:[#allocation8 + $0xf80] sm:$0xff] }
 0x198   :  { %4115 = vmatprep.subr.bf16.mxu1 %v4114_v47  ;;  %v4132_v47 = vpack.c.bf16 %v536_v40, %v535_v37  ;;  %v4134_v48 = vpack.c.bf16 %v570_v42, %v569_v41  ;;  %v561_v37 = vld [vmem:[#allocation8 + $0xe40] sm:$0xff]  ;;  %v594_v41 = vld [vmem:[#allocation8 + $0xf48] sm:$0xff]  ;;  %v579_v42 = vld [vmem:[#allocation8 + $0xed0] sm:$0xff] }
 0x19a   :  { %4085 = vmatpush3.bf16.msra.mxu0 %v4084_v53  ;;  %v571_v53 = vld [vmem:[#allocation8 + $0xe90] sm:$0xff] }
 0x19b   :  { %4117 = vmatpush3.bf16.msra.mxu1 %v4116_v54  ;;  %4087 = vmatprep.subr.bf16.mxu0 %v4086_v55  ;;  %v572_v54 = vld [vmem:[#allocation8 + $0xe98] sm:$0xff]  ;;  %v603_v55 = vld [vmem:[#allocation8 + $0xf90] sm:$0xff] }
 0x19c   :  { %4119 = vmatprep.subr.bf16.mxu1 %v4118_v59  ;;  %v99_v59 = vld [vmem:[#allocation3 + $0xd0] sm:$0xff]  ;;  %v4138_v61 = vpack.c.bf16 %v572_v54, %v571_v53  ;;  %v596_v53 = vld [vmem:[#allocation8 + $0xf58] sm:$0xff]  ;;  %v581_v54 = vld [vmem:[#allocation8 + $0xee0] sm:$0xff] }
 0x19e   :  { %4089 = vmatpush3.bf16.msra.mxu0 %v4088_v2  ;;  %v4170_v2 = vpack.c.bf16 %v604_v56, %v603_v55  ;;  %v582_v55 = vld [vmem:[#allocation8 + $0xee8] sm:$0xff]  ;;  %v613_v56 = vld [vmem:[#allocation8 + $0xfe0] sm:$0xff] }
 0x19f   :  { %4121 = vmatpush3.bf16.msra.mxu1 %v4120_v3  ;;  %4091 = vmatprep.subr.bf16.mxu0 %v4090_v4  ;;  %v588_v3 = vld [vmem:[#allocation8 + $0xf18] sm:$0xff]  ;;  %v573_v4 = vld [vmem:[#allocation8 + $0xea0] sm:$0xff] }
 0x1a0   :  { %v2832_v20 = vpop.f32.mrb[6].mxu0  ;;  %4123 = vmatprep.subr.bf16.mxu1 %v4122_v7  ;;  %v102_v7 = vld [vmem:[#allocation3 + $0xe8] sm:$0xff]  ;;  %v4172_v10 = vpack.c.bf16 %v588_v3, %v587_v1  ;;  %v4142_v11 = vpack.c.bf16 %v574_v5, %v573_v4  ;;  %v583_v4 = vld [vmem:[#allocation8 + $0xef0] sm:$0xff]  ;;  %v584_v5 = vld [vmem:[#allocation8 + $0xef8] sm:$0xff] }
 0x1a1   :  { %v2833_v25 = vpop.f32.mrb[7].mxu0  ;;  %v2867_v36 = vpop.f32.mrb[6].mxu1  ;;  %v598_v3 = vld [vmem:[#allocation8 + $0xf68] sm:$0xff] }
 0x1a2   :  { %v2834_v28 = vadd.f32 %v2833_v25, %v2832_v20  ;;  %4093 = vmatpush3.bf16.msra.mxu0 %v4092_v13  ;;  %v2868_v29 = vpop.f32.mrb[7].mxu1  ;;  %v558_v13 = vld [vmem:[#allocation8 + $0xe28] sm:$0xff]  ;;  %v607_v20 = vld [vmem:[#allocation8 + $0xfb0] sm:$0xff] }
 0x1a3   :  { %v2869_v31 = vadd.f32 %v2868_v29, %v2867_v36  ;;  %4125 = vmatpush3.bf16.msra.mxu1 %v4124_v14  ;;  %4095 = vmatprep.subr.bf16.mxu0 %v4094_v15  ;;  %v589_v14 = vld [vmem:[#allocation8 + $0xf20] sm:$0xff]  ;;  %v4174_v15 = vpack.c.bf16 %v606_v19, %v605_v6  ;;  %v4144_v22 = vpack.c.bf16 %v558_v13, %v557_v12  ;;  %v559_v25 = vld [vmem:[#allocation8 + $0xe30] sm:$0xff]  ;;  %v560_v36 = vld [vmem:[#allocation8 + $0xe38] sm:$0xff] }
 0x1a4   :  { %v1376_v38 = vadd.f32 %v2834_v28, %v4414_v0  ;;  %4127 = vmatprep.subr.bf16.mxu1 %v4126_v21  ;;  %v4166_v0 = vpack.c.bf16 %v602_v44, %v601_v43  ;;  %v608_v21 = vld [vmem:[#allocation8 + $0xfb8] sm:$0xff]  ;;  %v4176_v23 = vpack.c.bf16 %v590_v16, %v589_v14  ;;  %v577_v29 = vld [vmem:[#allocation8 + $0xec0] sm:$0xff]  ;;  %v611_v44 = vld [vmem:[#allocation8 + $0xfd0] sm:$0xff]  ;;  %v4192_v13 = vpack.c.bf16 %v598_v3, %v597_v63 }
 0x1a5   :  { %v4178_v27 = vpack.c.bf16 %v608_v21, %v607_v20  ;;  %v592_v28 = vld [vmem:[#allocation8 + $0xf38] sm:$0xff]  ;;  %v4162_v14 = vpack.c.bf16 %v584_v5, %v583_v4  ;;  %v599_v20 = vld [vmem:[#allocation8 + $0xf70] sm:$0xff] }
 0x1a6   :  { %v4417_v45 = vadd.f32 %v2869_v31, %v1376_v38  ;;  %4097 = vmatpush3.bf16.msra.mxu0 %v4096_v30  ;;  %v578_v30 = vld [vmem:[#allocation8 + $0xec8] sm:$0xff]  ;;  %v609_v31 = vld [vmem:[#allocation8 + $0xfc0] sm:$0xff]  ;;  %v4180_v34 = vpack.c.bf16 %v592_v28, %v591_v26  ;;  %v580_v43 = vld [vmem:[#allocation8 + $0xed8] sm:$0xff] }
 0x1a7   :  { %4129 = vmatpush3.bf16.msra.mxu1 %v4128_v32  ;;  %4099 = vmatprep.subr.bf16.mxu0 %v4098_v33  ;;  %v610_v32 = vld [vmem:[#allocation8 + $0xfc8] sm:$0xff]  ;;  %v4148_v33 = vpack.c.bf16 %v560_v36, %v559_v25  ;;  %v4150_v35 = vpack.c.bf16 %v578_v30, %v577_v29  ;;  %v4154_v49 = vpack.c.bf16 %v580_v43, %v579_v42  ;;  %v568_v16 = vld [vmem:[#allocation8 + $0xe78] sm:$0xff]  ;;  %v101_v25 = vld [vmem:[#allocation3 + $0xe0] sm:$0xff] }
 0x1a8   :  { %4131 = vmatprep.subr.bf16.mxu1 %v4130_v39  ;;  %v562_v38 = vld [vmem:[#allocation8 + $0xe48] sm:$0xff]  ;;  %v593_v39 = vld [vmem:[#allocation8 + $0xf40] sm:$0xff]  ;;  %v4182_v40 = vpack.c.bf16 %v610_v32, %v609_v31  ;;  %v600_v21 = vld [vmem:[#allocation8 + $0xf78] sm:$0xff] }
 0x1a9   :  { %v103_v36 = vld [vmem:[#allocation3 + $0xf0] sm:$0xff] }
 0x1aa   :  { %4101 = vmatpush3.bf16.msra.mxu0 %v4100_v46  ;;  %v612_v46 = vld [vmem:[#allocation8 + $0xfd8] sm:$0xff] }
 0x1ab   :  { %4133 = vmatpush3.bf16.msra.mxu1 %v4132_v47  ;;  %4135 = vmatprep.subr.bf16.mxu0 %v4134_v48  ;;  %v4152_v47 = vpack.c.bf16 %v562_v38, %v561_v37  ;;  %v4184_v48 = vpack.c.bf16 %v594_v41, %v593_v39  ;;  %v4186_v52 = vpack.c.bf16 %v612_v46, %v611_v44 }
 0x1ac   :  { %4167 = vmatprep.subr.bf16.mxu1 %v4166_v0  ;;  %v595_v0 = vld [vmem:[#allocation8 + $0xf50] sm:$0xff] }
 0x1ad   :  { %2354 = vmatmul.mubr.f32.vlgmr.msra.gmra.mrb[20].mxu0 %v97_v57  ;;  %v614_v57 = vld [vmem:[#allocation8 + $0xfe8] sm:$0xff] }
 0x1ae   :  { %4137 = vmatpush3.bf16.msra.mxu0 %v4136_v58  ;;  %2424 = vmatmul.mubr.f32.vlgmr.msra.gmra.mrb[20].mxu1 %v99_v59  ;;  %v4156_v58 = vpack.c.bf16 %v564_v51, %v563_v50  ;;  %v4188_v59 = vpack.c.bf16 %v596_v53, %v595_v0 }
 0x1af   :  { %4169 = vmatpush3.bf16.msra.mxu1 %v4168_v60  ;;  %4139 = vmatprep.subr.bf16.mxu0 %v4138_v61  ;;  %v4158_v60 = vpack.c.bf16 %v582_v55, %v581_v54  ;;  %v565_v61 = vld [vmem:[#allocation8 + $0xe60] sm:$0xff] }
 0x1b0   :  { %4171 = vmatprep.subr.bf16.mxu1 %v4170_v2  ;;  %2493 = vmatprep.mubr.f32.mxu0 %v102_v7  ;;  %v4190_v2 = vpack.c.bf16 %v614_v57, %v613_v56  ;;  %v615_v7 = vld [vmem:[#allocation8 + $0xff0] sm:$0xff] }
 0x1b1   :  { %2563 = vmatprep.mubr.f32.mxu1 %v104_v9 }
 0x1b2   :  { %4141 = vmatpush3.bf16.msra.mxu0 %v4140_v8  ;;  %v616_v8 = vld [vmem:[#allocation8 + $0xff8] sm:$0xff] }
 0x1b3   :  { %4173 = vmatpush3.bf16.msra.mxu1 %v4172_v10  ;;  %4143 = vmatprep.subr.bf16.mxu0 %v4142_v11  ;;  %v4160_v11 = vpack.c.bf16 %v566_v62, %v565_v61  ;;  %v4194_v18 = vpack.c.bf16 %v616_v8, %v615_v7 }
 0x1b4   :  { %4175 = vmatprep.subr.bf16.mxu1 %v4174_v15  ;;  %v567_v15 = vld [vmem:[#allocation8 + $0xe70] sm:$0xff] }
 0x1b6   :  { %4145 = vmatpush3.bf16.msra.mxu0 %v4144_v22 }
 0x1b7   :  { %4177 = vmatpush3.bf16.msra.mxu1 %v4176_v23  ;;  %4147 = vmatprep.subr.bf16.mxu0 %v4146_v24  ;;  %v4164_v23 = vpack.c.bf16 %v568_v16, %v567_v15  ;;  %v4196_v24 = vpack.c.bf16 %v600_v21, %v599_v20 }
 0x1b8   :  { %4179 = vmatprep.subr.bf16.mxu1 %v4178_v27 }
 0x1ba   :  { %4149 = vmatpush3.bf16.msra.mxu0 %v4148_v33 }
 0x1bb   :  { %4181 = vmatpush3.bf16.msra.mxu1 %v4180_v34  ;;  %4151 = vmatprep.subr.bf16.mxu0 %v4150_v35 }
 0x1bc   :  { %4183 = vmatprep.subr.bf16.mxu1 %v4182_v40 }
 0x1be   :  { %4153 = vmatpush3.bf16.msra.mxu0 %v4152_v47 }
 0x1bf   :  { %4185 = vmatpush3.bf16.msra.mxu1 %v4184_v48  ;;  %4155 = vmatprep.subr.bf16.mxu0 %v4154_v49 }
 0x1c0   :  { %v2902_v1 = vpop.f32.mrb[8].mxu0  ;;  %4187 = vmatprep.subr.bf16.mxu1 %v4186_v52 }
 0x1c1   :  { %v2903_v6 = vpop.f32.mrb[9].mxu0  ;;  %v2937_v19 = vpop.f32.mrb[8].mxu1 }
 0x1c2   :  { %v2904_v9 = vadd.f32 %v2903_v6, %v2902_v1  ;;  %4157 = vmatpush3.bf16.msra.mxu0 %v4156_v58  ;;  %v2938_v10 = vpop.f32.mrb[9].mxu1 }
 0x1c3   :  { %v2939_v12 = vadd.f32 %v2938_v10, %v2937_v19  ;;  %4189 = vmatpush3.bf16.msra.mxu1 %v4188_v59  ;;  %4159 = vmatprep.subr.bf16.mxu0 %v4158_v60 }
 0x1c4   :  { %v1516_v17 = vadd.f32 %v2904_v9, %v4417_v45  ;;  %4191 = vmatprep.subr.bf16.mxu1 %v4190_v2 }
 0x1c6   :  { %v1586_v22 = vadd.f32 %v2939_v12, %v1516_v17  ;;  %4161 = vmatpush3.bf16.msra.mxu0 %v4160_v11  ;;  %v2570_v17 = vstv %s4435_s0 }
 0x1c7   :  { %4193 = vmatpush3.bf16.msra.mxu1 %v4192_v13  ;;  %4163 = vmatprep.subr.bf16.mxu0 %v4162_v14 }
 0x1c8   :  { %4195 = vmatprep.subr.bf16.mxu1 %v4194_v18 }
 0x1ca   :  { %4165 = vmatpush3.bf16.msra.mxu0 %v4164_v23 }
 0x1cb   :  { %4197 = vmatpush3.bf16.msra.mxu1 %v4196_v24 }
 0x1cd   :  { %2494 = vmatmul.mubr.f32.vlgmr.msra.gmra.mrb[22].mxu0 %v101_v25 }
 0x1ce   :  { %2564 = vmatmul.mubr.f32.vlgmr.msra.gmra.mrb[22].mxu1 %v103_v36 }
 0x1e0   :  { %v2972_v26 = vpop.f32.mrb[10].mxu0 }
 0x1e1   :  { %v2973_v27 = vpop.f32.mrb[11].mxu0  ;;  %v3007_v45 = vpop.f32.mrb[10].mxu1 }
 0x1e2   :  { %v2974_v28 = vadd.f32 %v2973_v27, %v2972_v26  ;;  %v3008_v29 = vpop.f32.mrb[11].mxu1 }
 0x1e3   :  { %v3009_v30 = vadd.f32 %v3008_v29, %v3007_v45 }
 0x1e4   :  { %v1656_v31 = vadd.f32 %v2974_v28, %v1586_v22 }
 0x1e6   :  { %v1726_v32 = vadd.f32 %v3009_v30, %v1656_v31 }
 0x200   :  { %v3042_v33 = vpop.f32.mrb[12].mxu0 }
 0x201   :  { %v3043_v34 = vpop.f32.mrb[13].mxu0  ;;  %v3077_v35 = vpop.f32.mrb[12].mxu1 }
 0x202   :  { %v3044_v37 = vadd.f32 %v3043_v34, %v3042_v33  ;;  %v3078_v38 = vpop.f32.mrb[13].mxu1 }
 0x203   :  { %v3079_v39 = vadd.f32 %v3078_v38, %v3077_v35 }
 0x204   :  { %v1796_v40 = vadd.f32 %v3044_v37, %v1726_v32 }
 0x206   :  { %v1866_v41 = vadd.f32 %v3079_v39, %v1796_v40 }
 0x220   :  { %v3112_v42 = vpop.f32.mrb[14].mxu0 }
 0x221   :  { %v3113_v43 = vpop.f32.mrb[15].mxu0  ;;  %v3147_v44 = vpop.f32.mrb[14].mxu1 }
 0x222   :  { %v3114_v46 = vadd.f32 %v3113_v43, %v3112_v42  ;;  %v3148_v47 = vpop.f32.mrb[15].mxu1 }
 0x223   :  { %v3149_v48 = vadd.f32 %v3148_v47, %v3147_v44 }
 0x224   :  { %v1936_v49 = vadd.f32 %v3114_v46, %v1866_v41 }
 0x226   :  { %v2006_v50 = vadd.f32 %v3149_v48, %v1936_v49 }
 0x240   :  { %v3182_v51 = vpop.f32.mrb[16].mxu0 }
 0x241   :  { %v3183_v0 = vpop.f32.mrb[17].mxu0  ;;  %v3217_v52 = vpop.f32.mrb[16].mxu1 }
 0x242   :  { %v3184_v53 = vadd.f32 %v3183_v0, %v3182_v51  ;;  %v3218_v54 = vpop.f32.mrb[17].mxu1 }
 0x243   :  { %v3219_v55 = vadd.f32 %v3218_v54, %v3217_v52 }
 0x244   :  { %v2076_v56 = vadd.f32 %v3184_v53, %v2006_v50 }
 0x246   :  { %v2146_v57 = vadd.f32 %v3219_v55, %v2076_v56 }
 0x260   :  { %v3252_v58 = vpop.f32.mrb[18].mxu0 }
 0x261   :  { %v3253_v59 = vpop.f32.mrb[19].mxu0  ;;  %v3287_v60 = vpop.f32.mrb[18].mxu1 }
 0x262   :  { %v3254_v61 = vadd.f32 %v3253_v59, %v3252_v58  ;;  %v3288_v62 = vpop.f32.mrb[19].mxu1 }
 0x263   :  { %v3289_v63 = vadd.f32 %v3288_v62, %v3287_v60 }
 0x264   :  { %v2216_v1 = vadd.f32 %v3254_v61, %v2146_v57 }
 0x266   :  { %v2286_v2 = vadd.f32 %v3289_v63, %v2216_v1 }
 0x280   :  { %v3322_v3 = vpop.f32.mrb[20].mxu0 }
 0x281   :  { %v3323_v4 = vpop.f32.mrb[21].mxu0  ;;  %v3357_v5 = vpop.f32.mrb[20].mxu1 }
 0x282   :  { %v3324_v6 = vadd.f32 %v3323_v4, %v3322_v3  ;;  %v3358_v19 = vpop.f32.mrb[21].mxu1 }
 0x283   :  { %v3359_v7 = vadd.f32 %v3358_v19, %v3357_v5 }
 0x284   :  { %v2356_v8 = vadd.f32 %v3324_v6, %v2286_v2 }
 0x286   :  { %v2426_v9 = vadd.f32 %v3359_v7, %v2356_v8 }
 0x2a0   :  { %v3392_v10 = vpop.f32.mrb[22].mxu0 }
 0x2a1   :  { %v3393_v11 = vpop.f32.mrb[23].mxu0  ;;  %v3427_v12 = vpop.f32.mrb[22].mxu1 }
 0x2a2   :  { %v3394_v13 = vadd.f32 %v3393_v11, %v3392_v10  ;;  %v3428_v14 = vpop.f32.mrb[23].mxu1 }
 0x2a3   :  { %v3429_v15 = vadd.f32 %v3428_v14, %v3427_v12 }
 0x2a4   :  { %v2496_v16 = vadd.f32 %v3394_v13, %v2426_v9 }
 0x2a6   :  { %v2566_v18 = vadd.f32 %v3429_v15, %v2496_v16 }
 0x2a8   :  { %v2571_v20 = vadd.f32 %v2570_v17, %v2566_v18 }
 0x2aa   :  { %2572 = vst [vmem:[#allocation11] sm:$0xff] %v2571_v20 }
 0x2ab   :  { %4304 = shalt.err (!%p4301_p8)
}
 0x2ac   :  { %s4305_s20 = scalar_lea.hbm %s4440_s5, 128 }
 0x2ad   :  { %p4306_p9 = scmp.ne.s32.totalorder %s4440_s5, %s4305_s20  ;;  %p4309_p10 = scmp.lt.u32.totalorder %s4305_s20, %s4440_s5 }
 0x2af   :  { %p4311_p11 = pnand %p4309_p10, %p4306_p9 }
 0x2b1   :  { %4314 = shalt.err (!%p4311_p11)
}
 0x2b2   :  { %2582 = dma.vmem_to_hbm [thread:$0]  %s2580_s16, 128, %s4440_s5, [#allocation5]  }
 0x2b3   :  { %4321 = dma.done.wait [#allocation5], 128  }
 0x2b4   :  { %4322 = vsyncadd [#allocation5], 4294967168 }
 0x2b5   :  { %2586 = vsyncpa [#allocation4], 1 }
 0x2b6   :  { %2587 = vsyncpa [#allocation7], 1 }
 0x2b7   :  { %2588 = vsyncpa [#allocation10], 1 }
 0x2b8   :  { %2589 = vsyncpa [#allocation5], 1 }

</bundles_post_ra>
